<compile_context>
chip_gen: v6e
topology: v6e:2x2x1
jax: 0.10.0
libtpu: 0.0.40
codegen_flags: <defaults>
</compile_context>

<pallas_src>
import functools

import jax
import jax.numpy as jnp
from jax import lax
from jax.experimental import pallas as pl
from jax.experimental.pallas import tpu as pltpu

BN_EPS = 1e-5          # nn.BatchNorm2d default eps
LEAKY_SLOPE = 0.01     # nn.LeakyReLU default negative_slope

_VMEM_LIMIT = 32 * 1024 * 1024   # explicit scoped-VMEM budget (safe on v5e/v6e/v7x)
_PIPE_BUDGET = 8 * 1024 * 1024   # target bytes for double-buffered tiles per call


# ----------------------------------------------------------------------------
# small helpers
# ----------------------------------------------------------------------------
def _round_up(x, m):
    return (x + m - 1) // m * m


def _pick_div_tile(total, target, quantum):
    """Largest multiple of `quantum` that divides `total` and is <= `target`.

    Falls back to `total` (single full-extent block; full-extent last-two dims
    are exempt from the (8,128) block-shape rule) when no such divisor exists.
    """
    t = min(target, total)
    t -= t % quantum
    while t >= quantum:
        if total % t == 0:
            return t
        t -= quantum
    return total


# ----------------------------------------------------------------------------
# Pallas kernels
# ----------------------------------------------------------------------------
def _conv_bias_stats_kernel(p_ref, w_ref, b_ref, y_ref, s_ref, q_ref):
    # im2col-patch tile @ weight: bf16 MXU inputs, f32 accumulation, + conv bias
    y = jnp.dot(p_ref[...], w_ref[...], preferred_element_type=jnp.float32)
    y = y + b_ref[...]
    y_ref[...] = y
    # per-tile partial BatchNorm statistics (combined in tiny JAX glue)
    c = y.shape[1]
    s_ref[0] = jnp.broadcast_to(jnp.sum(y, axis=0, keepdims=True), (8, c))
    q_ref[0] = jnp.broadcast_to(jnp.sum(y * y, axis=0, keepdims=True), (8, c))


def _bn_lrelu_kernel(y_ref, scale_ref, shift_ref, o_ref):
    # BatchNorm folded to per-channel scale/shift + LeakyReLU (one VPU max)
    y = y_ref[...] * scale_ref[...] + shift_ref[...]
    o_ref[...] = jnp.maximum(y, LEAKY_SLOPE * y).astype(o_ref.dtype)


def _linear_reparam_kernel(x_ref, w_ref, b_ref, eps_ref,
                           mean_ref, logvar_ref, z_ref, acc_ref):
    # fused (mean | logvar) matmul, K-tiled over the flattened feature dim
    @pl.when(pl.program_id(0) == 0)
    def _init():
        acc_ref[...] = jnp.zeros_like(acc_ref)

    acc_ref[...] += jnp.dot(x_ref[...], w_ref[...],
                            preferred_element_type=jnp.float32)

    @pl.when(pl.program_id(0) == pl.num_programs(0) - 1)
    def _finalize():
        y = acc_ref[...] + b_ref[...]
        zd = mean_ref.shape[1]
        mean = y[:, :zd]
        logvar = y[:, zd:]
        mean_ref[...] = mean
        logvar_ref[...] = logvar
        z_ref[...] = mean + jnp.exp(0.5 * logvar) * eps_ref[...]


# ----------------------------------------------------------------------------
# im2col (NHWC, k=3, stride=2, pad=1), zero K-padding folded into the build
# ----------------------------------------------------------------------------
def _im2col_nhwc(x, oh, ow, k_pad):
    """x: (N, H, W, C) -> (N*OH*OW, k_pad) patches, columns ordered (kh,kw,cin)."""
    n, h, w, c = x.shape
    xp = jnp.pad(x, ((0, 0), (1, 1), (1, 1), (0, 0)))
    m = n * oh * ow
    cols = []
    for kh in range(3):
        for kw in range(3):
            cols.append(xp[:, kh:kh + 2 * oh:2, kw:kw + 2 * ow:2, :].reshape(m, c))
    k = 9 * c
    if k_pad > k:
        cols.append(jnp.zeros((m, k_pad - k), x.dtype))
    return jnp.concatenate(cols, axis=1)


# ----------------------------------------------------------------------------
# one Conv2d(k=3,s=2,p=1) + BatchNorm2d(train) + LeakyReLU layer
# ----------------------------------------------------------------------------
def conv_bn_lrelu(act, weight, bias, gamma, beta, *, max_tile_rows=1024):
    """act: (N, H, W, Cin) bf16 NHWC -> (N, H//2, W//2, Cout) bf16 NHWC."""
    n, h, w_sp, cin = act.shape
    oh, ow = h // 2, w_sp // 2
    cout = weight.shape[0]
    m = n * oh * ow
    k = cin * 9
    k_pad = _round_up(k, 128)

    patches = _im2col_nhwc(act, oh, ow, k_pad)                     # (m, k_pad) bf16
    # OIHW -> (kh, kw, cin, cout) -> (k, cout): matches the patch column order.
    w_mat = jnp.transpose(weight, (2, 3, 1, 0)).reshape(k, cout)
    w_mat = jnp.pad(w_mat, ((0, k_pad - k), (0, 0))).astype(jnp.bfloat16)
    bias_row = bias.reshape(1, cout).astype(jnp.float32)

    # ---- pass 1: tiled matmul + bias, plus per-tile partial BN stats --------
    per_row = 2 * (k_pad * 2) + 2 * (cout * 4)   # double-buffered bf16 in + f32 out
    cap = max(16, min(max_tile_rows, _PIPE_BUDGET // per_row))
    tile_m = _pick_div_tile(m, cap, 16)
    nt = m // tile_m

    y_full, psum, psq = pl.pallas_call(
        _conv_bias_stats_kernel,
        out_shape=(jax.ShapeDtypeStruct((m, cout), jnp.float32),
                   jax.ShapeDtypeStruct((nt, 8, cout), jnp.float32),
                   jax.ShapeDtypeStruct((nt, 8, cout), jnp.float32)),
        grid=(nt,),
        in_specs=[pl.BlockSpec((tile_m, k_pad), lambda i: (i, 0)),
                  pl.BlockSpec((k_pad, cout), lambda i: (0, 0)),    # weight resident
                  pl.BlockSpec((1, cout), lambda i: (0, 0))],       # bias resident
        out_specs=(pl.BlockSpec((tile_m, cout), lambda i: (i, 0)),
                   pl.BlockSpec((1, 8, cout), lambda i: (i, 0, 0)),
                   pl.BlockSpec((1, 8, cout), lambda i: (i, 0, 0))),
        compiler_params=pltpu.CompilerParams(
            dimension_semantics=("parallel",),
            vmem_limit_bytes=_VMEM_LIMIT),
    )(patches, w_mat, bias_row)

    # ---- combine stats; fold BN into one per-channel scale/shift (tiny) -----
    total = jnp.sum(psum[:, 0, :], axis=0)
    total_sq = jnp.sum(psq[:, 0, :], axis=0)
    mu = total / m
    var = jnp.maximum(total_sq / m - mu * mu, 0.0)   # biased var (train mode)
    scale = gamma * lax.rsqrt(var + BN_EPS)
    shift = beta - mu * scale

    # ---- pass 2: normalize + LeakyReLU over a lane-packed (M/8, 8*C) view ---
    if m % 8 == 0:
        rows, width = m // 8, 8 * cout
        y_view = y_full.reshape(rows, width)          # contiguous: free view
        scale_row = jnp.tile(scale, 8).reshape(1, width)
        shift_row = jnp.tile(shift, 8).reshape(1, width)
    else:
        rows, width = m, cout
        y_view = y_full
        scale_row = scale.reshape(1, width)
        shift_row = shift.reshape(1, width)

    per_row2 = 2 * width * (4 + 2)                    # f32 in + bf16 out, dbl-buffered
    cap2 = max(16, min(max(16, max_tile_rows // 8), _PIPE_BUDGET // per_row2))
    tile2 = _pick_div_tile(rows, cap2, 16)

    out = pl.pallas_call(
        _bn_lrelu_kernel,
        out_shape=jax.ShapeDtypeStruct((rows, width), jnp.bfloat16),
        grid=(rows // tile2,),
        in_specs=[pl.BlockSpec((tile2, width), lambda i: (i, 0)),
                  pl.BlockSpec((1, width), lambda i: (0, 0)),
                  pl.BlockSpec((1, width), lambda i: (0, 0))],
        out_specs=pl.BlockSpec((tile2, width), lambda i: (i, 0)),
        compiler_params=pltpu.CompilerParams(
            dimension_semantics=("parallel",),
            vmem_limit_bytes=_VMEM_LIMIT),
    )(y_view, scale_row, shift_row)

    return out.reshape(n, oh, ow, cout)               # bf16 NHWC


# ----------------------------------------------------------------------------
# full encoder forward
# ----------------------------------------------------------------------------
def encoder_forward(x, conv_params, w_lin, b_lin, eps_noise,
                    *, max_tile_rows=1024, lin_tile_d=2048):
    """x: (N, C, H, W) f32 NCHW.  Returns (flat_features, z_mean, z_logvar, z)."""
    n = x.shape[0]
    # single NCHW -> NHWC transpose at the boundary; bf16 storage between layers
    y = jnp.transpose(x, (0, 2, 3, 1)).astype(jnp.bfloat16)
    for (w_c, b_c, g_c, bt_c) in conv_params:
        y = conv_bn_lrelu(y, w_c, b_c, g_c, bt_c, max_tile_rows=max_tile_rows)

    # torch.flatten(start_dim=1) flattens NCHW, i.e. (c, h, w) order
    flat = jnp.transpose(y, (0, 3, 1, 2)).reshape(n, -1)           # bf16, (n, d)

    z_dim = w_lin.shape[0] // 2
    d = flat.shape[1]
    w_cat = jnp.transpose(w_lin).astype(jnp.bfloat16)              # (d, 2*z) = [mean|logvar]
    b_cat = b_lin.reshape(1, 2 * z_dim).astype(jnp.float32)

    # K-tile the contraction (flattened feature) dim; pad with zero columns.
    lin_tile_d = max(128, (lin_tile_d // 128) * 128)
    tile_d = min(lin_tile_d, _round_up(d, 128))
    dp = _round_up(d, tile_d)
    if dp != d:
        flat_in = jnp.pad(flat, ((0, 0), (0, dp - d)))
        w_in = jnp.pad(w_cat, ((0, dp - d), (0, 0)))
    else:
        flat_in, w_in = flat, w_cat
    nk = dp // tile_d

    mean, logvar, z = pl.pallas_call(
        _linear_reparam_kernel,
        out_shape=(jax.ShapeDtypeStruct((n, z_dim), jnp.float32),
                   jax.ShapeDtypeStruct((n, z_dim), jnp.float32),
                   jax.ShapeDtypeStruct((n, z_dim), jnp.float32)),
        grid=(nk,),
        in_specs=[pl.BlockSpec((n, tile_d), lambda kk: (0, kk)),
                  pl.BlockSpec((tile_d, 2 * z_dim), lambda kk: (kk, 0)),
                  pl.BlockSpec((1, 2 * z_dim), lambda kk: (0, 0)),
                  pl.BlockSpec((n, z_dim), lambda kk: (0, 0))],
        out_specs=(pl.BlockSpec((n, z_dim), lambda kk: (0, 0)),
                   pl.BlockSpec((n, z_dim), lambda kk: (0, 0)),
                   pl.BlockSpec((n, z_dim), lambda kk: (0, 0))),
        scratch_shapes=[pltpu.VMEM((n, 2 * z_dim), jnp.float32)],
        compiler_params=pltpu.CompilerParams(
            dimension_semantics=("arbitrary",),
            vmem_limit_bytes=_VMEM_LIMIT),
    )(flat_in, w_in, b_cat, eps_noise.astype(jnp.float32))

    return flat.astype(jnp.float32), mean, logvar, z


# ----------------------------------------------------------------------------
# deterministic parameter init (matches module __init__ shapes; Linear zeroed)
# ----------------------------------------------------------------------------
def init_params(key, size, in_dim, z_dim, h_dims):
    conv_params = []
    cin = in_dim
    s = size
    for hd in h_dims:
        s = s // 2
        key, k1, k2 = jax.random.split(key, 3)
        fan_in = cin * 9
        w = jax.random.normal(k1, (hd, cin, 3, 3), jnp.float32) / jnp.sqrt(fan_in)
        b = 0.1 * jax.random.normal(k2, (hd,), jnp.float32)
        gamma = jnp.ones((hd,), jnp.float32)     # BatchNorm2d default weight
        beta = jnp.zeros((hd,), jnp.float32)     # BatchNorm2d default bias
        conv_params.append((w, b, gamma, beta))
        cin = hd
    flat_dim = h_dims[-1] * s * s
    w_lin = jnp.zeros((2 * z_dim, flat_dim), jnp.float32)   # .weight.data.zero_()
    b_lin = jnp.zeros((2 * z_dim,), jnp.float32)            # .bias.data.zero_()
    return conv_params, w_lin, b_lin


# ----------------------------------------------------------------------------
# pure-JAX reference (same mixed-precision policy as the kernels)
# ----------------------------------------------------------------------------
def ref_forward(x, conv_params, w_lin, b_lin, eps_noise):
    y = x.astype(jnp.bfloat16)
    for (w, b, g, bt) in conv_params:
        yc = lax.conv_general_dilated(
            y, w.astype(jnp.bfloat16), (2, 2), ((1, 1), (1, 1)),
            dimension_numbers=('NCHW', 'OIHW', 'NCHW'),
            preferred_element_type=jnp.float32)
        yc = yc + b[None, :, None, None]
        mu = jnp.mean(yc, axis=(0, 2, 3), keepdims=True)
        var = jnp.mean((yc - mu) ** 2, axis=(0, 2, 3), keepdims=True)
        yc = (yc - mu) * lax.rsqrt(var + BN_EPS) * g[None, :, None, None] \
            + bt[None, :, None, None]
        yc = jnp.where(yc >= 0, yc, LEAKY_SLOPE * yc)
        y = yc.astype(jnp.bfloat16)
    flat = y.reshape(y.shape[0], -1).astype(jnp.float32)
    w_l = w_lin.astype(jnp.bfloat16).astype(jnp.float32)
    out = flat @ w_l.T + b_lin
    zd = w_lin.shape[0] // 2
    mean, logvar = out[:, :zd], out[:, zd:]
    z = mean + jnp.exp(0.5 * logvar) * eps_noise
    return flat, mean, logvar, z


if __name__ == "__main__":
    # small shapes consistent with the module
    batch, in_dim, size = 4, 4, 16
    h_dims = [16, 32, 64]
    z_dim = 8

    key = jax.random.PRNGKey(0)
    key, kx, keps, kp, kw2, kb2 = jax.random.split(key, 6)
    x = jax.random.normal(kx, (batch, in_dim, size, size), jnp.float32)
    # TODO(synk): torch.randn_like RNG stream cannot be bit-matched; the
    # reparameterization noise is drawn once with jax.random and passed in.
    eps_noise = jax.random.normal(keps, (batch, z_dim), jnp.float32)

    conv_params, w_lin, b_lin = init_params(kp, size, in_dim, z_dim, h_dims)

    # small tile caps so the demo shapes actually exercise multi-tile grids
    fwd = jax.jit(functools.partial(encoder_forward,
                                    max_tile_rows=64, lin_tile_d=128))

    flat, z_mean, z_logvar, z = fwd(x, conv_params, w_lin, b_lin, eps_noise)
    jax.block_until_ready((flat, z_mean, z_logvar, z))

    r_flat, r_mean, r_logvar, r_z = ref_forward(x, conv_params, w_lin, b_lin,
                                                eps_noise)
    assert jnp.allclose(flat, r_flat, atol=5e-2, rtol=5e-2), "conv stack mismatch"
    # Linear weights/bias are zeroed in the module __init__, so these are exact.
    assert jnp.allclose(z_mean, r_mean, atol=1e-5, rtol=1e-5)
    assert jnp.allclose(z_logvar, r_logvar, atol=1e-5, rtol=1e-5)
    assert jnp.allclose(z, r_z, atol=1e-5, rtol=1e-5)

    # second check: nonzero Linear weights exercise the K-tiled fused
    # (mean|logvar) matmul + reparameterization path.
    w_lin2 = 0.05 * jax.random.normal(kw2, w_lin.shape, jnp.float32)
    b_lin2 = 0.05 * jax.random.normal(kb2, b_lin.shape, jnp.float32)
    flat2, m2, lv2, z2 = fwd(x, conv_params, w_lin2, b_lin2, eps_noise)
    jax.block_until_ready((flat2, m2, lv2, z2))
    _, rm2, rlv2, rz2 = ref_forward(x, conv_params, w_lin2, b_lin2, eps_noise)
    assert jnp.allclose(m2, rm2, atol=2e-2, rtol=2e-2)
    assert jnp.allclose(lv2, rlv2, atol=2e-2, rtol=2e-2)
    assert jnp.allclose(z2, rz2, atol=2e-2, rtol=2e-2)

    print("KERNEL_OK")
</pallas_src>

<mosaic_0001>
module attributes {stable_mosaic.version = 11 : i64} {
  func.func @_conv_bias_stats_kernel(%arg0: i32, %arg1: memref<64x128xbf16, #tpu.memory_space<vmem>>, %arg2: memref<128x16xbf16, #tpu.memory_space<vmem>>, %arg3: memref<1x16xf32, #tpu.memory_space<vmem>>, %arg4: memref<64x16xf32, #tpu.memory_space<vmem>>, %arg5: memref<1x8x16xf32, #tpu.memory_space<vmem>>, %arg6: memref<1x8x16xf32, #tpu.memory_space<vmem>>) attributes {dimension_semantics = [#tpu.dimension_semantics<parallel>], iteration_bounds = array<i64: 4>, scalar_prefetch = 0 : i64, scratch_operands = 0 : i64, tpu.core_type = #tpu.core_type<tc>, window_params = [{transform_indices = @transform_0, window_bounds = array<i64: 64, 128>}, {pipeline_mode = #tpu.pipeline_mode<synchronous>, transform_indices = @transform_1, window_bounds = array<i64: 128, 16>}, {pipeline_mode = #tpu.pipeline_mode<synchronous>, transform_indices = @transform_2, window_bounds = array<i64: 1, 16>}, {transform_indices = @transform_3, window_bounds = array<i64: 64, 16>}, {transform_indices = @transform_4, window_bounds = array<i64: 1, 8, 16>}, {transform_indices = @transform_5, window_bounds = array<i64: 1, 8, 16>}]} {
    %c0 = arith.constant 0 : index
    %c0_0 = arith.constant 0 : index
    %0 = vector.load %arg1[%c0, %c0_0] : memref<64x128xbf16, #tpu.memory_space<vmem>>, vector<64x128xbf16>
    %c0_1 = arith.constant 0 : index
    %c0_2 = arith.constant 0 : index
    %1 = vector.load %arg2[%c0_1, %c0_2] : memref<128x16xbf16, #tpu.memory_space<vmem>>, vector<128x16xbf16>
    %cst = arith.constant dense<0.000000e+00> : vector<64x16xf32>
    %2 = tpu.matmul %0, %1, %cst {dimension_numbers = #tpu.dot_dimension_numbers<[1], [0], [0], [1], [0, 0, 1, 1], [], []>} : vector<64x128xbf16>, vector<128x16xbf16>, vector<64x16xf32> -> vector<64x16xf32>
    %c0_3 = arith.constant 0 : index
    %c0_4 = arith.constant 0 : index
    %3 = vector.load %arg3[%c0_3, %c0_4] : memref<1x16xf32, #tpu.memory_space<vmem>>, vector<1x16xf32>
    %4 = vector.broadcast %3 : vector<1x16xf32> to vector<64x16xf32>
    %5 = arith.addf %2, %4 : vector<64x16xf32>
    %c0_5 = arith.constant 0 : index
    %c0_6 = arith.constant 0 : index
    %6 = vector.load %arg4[%c0_5, %c0_6] : memref<64x16xf32, #tpu.memory_space<vmem>>, vector<64x16xf32>
    tpu.vector_store %arg4[%c0_5, %c0_6], %5 {strides = array<i32>} : memref<64x16xf32, #tpu.memory_space<vmem>>, vector<64x16xf32>,
    %cst_7 = arith.constant dense<0.000000e+00> : vector<16xf32>
    %7 = vector.multi_reduction <add>, %5, %cst_7 [0] : vector<64x16xf32> to vector<16xf32>
    %8 = vector.shape_cast %7 : vector<16xf32> to vector<1x16xf32>
    %9 = vector.shape_cast %8 : vector<1x16xf32> to vector<1x16xf32>
    %10 = vector.broadcast %9 : vector<1x16xf32> to vector<8x16xf32>
    %c0_8 = arith.constant 0 : index
    %c0_9 = arith.constant 0 : index
    %c0_10 = arith.constant 0 : index
    %11 = vector.load %arg5[%c0_8, %c0_9, %c0_10] : memref<1x8x16xf32, #tpu.memory_space<vmem>>, vector<1x8x16xf32>
    %12 = vector.shape_cast %11 : vector<1x8x16xf32> to vector<8x16xf32>
    %13 = vector.shape_cast %10 : vector<8x16xf32> to vector<1x8x16xf32>
    tpu.vector_store %arg5[%c0_8, %c0_9, %c0_10], %13 {strides = array<i32>} : memref<1x8x16xf32, #tpu.memory_space<vmem>>, vector<1x8x16xf32>,
    %14 = arith.mulf %5, %5 : vector<64x16xf32>
    %cst_11 = arith.constant dense<0.000000e+00> : vector<16xf32>
    %15 = vector.multi_reduction <add>, %14, %cst_11 [0] : vector<64x16xf32> to vector<16xf32>
    %16 = vector.shape_cast %15 : vector<16xf32> to vector<1x16xf32>
    %17 = vector.shape_cast %16 : vector<1x16xf32> to vector<1x16xf32>
    %18 = vector.broadcast %17 : vector<1x16xf32> to vector<8x16xf32>
    %c0_12 = arith.constant 0 : index
    %c0_13 = arith.constant 0 : index
    %c0_14 = arith.constant 0 : index
    %19 = vector.load %arg6[%c0_12, %c0_13, %c0_14] : memref<1x8x16xf32, #tpu.memory_space<vmem>>, vector<1x8x16xf32>
    %20 = vector.shape_cast %19 : vector<1x8x16xf32> to vector<8x16xf32>
    %21 = vector.shape_cast %18 : vector<8x16xf32> to vector<1x8x16xf32>
    tpu.vector_store %arg6[%c0_12, %c0_13, %c0_14], %21 {strides = array<i32>} : memref<1x8x16xf32, #tpu.memory_space<vmem>>, vector<1x8x16xf32>,
    return
  }
  func.func @transform_0(%arg0: i32) -> (i32, i32) {
    %c0_i32 = arith.constant 0 : i32
    %c0_i32_0 = arith.constant 0 : i32
    return %arg0, %c0_i32 : i32, i32
  }
  func.func @transform_1(%arg0: i32) -> (i32, i32) {
    %c0_i32 = arith.constant 0 : i32
    %c0_i32_0 = arith.constant 0 : i32
    %c0_i32_1 = arith.constant 0 : i32
    return %c0_i32, %c0_i32_0 : i32, i32
  }
  func.func @transform_2(%arg0: i32) -> (i32, i32) {
    %c0_i32 = arith.constant 0 : i32
    %c0_i32_0 = arith.constant 0 : i32
    %c0_i32_1 = arith.constant 0 : i32
    return %c0_i32, %c0_i32_0 : i32, i32
  }
  func.func @transform_3(%arg0: i32) -> (i32, i32) {
    %c0_i32 = arith.constant 0 : i32
    %c0_i32_0 = arith.constant 0 : i32
    return %arg0, %c0_i32 : i32, i32
  }
  func.func @transform_4(%arg0: i32) -> (i32, i32, i32) {
    %c0_i32 = arith.constant 0 : i32
    %c0_i32_0 = arith.constant 0 : i32
    %c0_i32_1 = arith.constant 0 : i32
    return %arg0, %c0_i32, %c0_i32_0 : i32, i32, i32
  }
  func.func @transform_5(%arg0: i32) -> (i32, i32, i32) {
    %c0_i32 = arith.constant 0 : i32
    %c0_i32_0 = arith.constant 0 : i32
    %c0_i32_1 = arith.constant 0 : i32
    return %arg0, %c0_i32, %c0_i32_0 : i32, i32, i32
  }
}

module attributes {stable_mosaic.version = 11 : i64} {
  func.func @_bn_lrelu_kernel(%arg0: i32, %arg1: memref<16x128xf32, #tpu.memory_space<vmem>>, %arg2: memref<1x128xf32, #tpu.memory_space<vmem>>, %arg3: memref<1x128xf32, #tpu.memory_space<vmem>>, %arg4: memref<16x128xbf16, #tpu.memory_space<vmem>>) attributes {dimension_semantics = [#tpu.dimension_semantics<parallel>], iteration_bounds = array<i64: 2>, scalar_prefetch = 0 : i64, scratch_operands = 0 : i64, tpu.core_type = #tpu.core_type<tc>, window_params = [{transform_indices = @transform_0, window_bounds = array<i64: 16, 128>}, {pipeline_mode = #tpu.pipeline_mode<synchronous>, transform_indices = @transform_1, window_bounds = array<i64: 1, 128>}, {pipeline_mode = #tpu.pipeline_mode<synchronous>, transform_indices = @transform_2, window_bounds = array<i64: 1, 128>}, {transform_indices = @transform_3, window_bounds = array<i64: 16, 128>}]} {
    %c0 = arith.constant 0 : index
    %c0_0 = arith.constant 0 : index
    %0 = vector.load %arg1[%c0, %c0_0] : memref<16x128xf32, #tpu.memory_space<vmem>>, vector<16x128xf32>
    %c0_1 = arith.constant 0 : index
    %c0_2 = arith.constant 0 : index
    %1 = vector.load %arg2[%c0_1, %c0_2] : memref<1x128xf32, #tpu.memory_space<vmem>>, vector<1x128xf32>
    %2 = vector.broadcast %1 : vector<1x128xf32> to vector<16x128xf32>
    %3 = arith.mulf %0, %2 : vector<16x128xf32>
    %c0_3 = arith.constant 0 : index
    %c0_4 = arith.constant 0 : index
    %4 = vector.load %arg3[%c0_3, %c0_4] : memref<1x128xf32, #tpu.memory_space<vmem>>, vector<1x128xf32>
    %5 = vector.broadcast %4 : vector<1x128xf32> to vector<16x128xf32>
    %6 = arith.addf %3, %5 : vector<16x128xf32>
    %cst = arith.constant 0.00999999977 : f32
    %7 = vector.broadcast %cst : f32 to vector<16x128xf32>
    %8 = arith.mulf %7, %6 : vector<16x128xf32>
    %9 = arith.maximumf %6, %8 : vector<16x128xf32>
    %10 = arith.truncf %9 : vector<16x128xf32> to vector<16x128xbf16>
    %c0_5 = arith.constant 0 : index
    %c0_6 = arith.constant 0 : index
    %11 = vector.load %arg4[%c0_5, %c0_6] : memref<16x128xbf16, #tpu.memory_space<vmem>>, vector<16x128xbf16>
    tpu.vector_store %arg4[%c0_5, %c0_6], %10 {strides = array<i32>} : memref<16x128xbf16, #tpu.memory_space<vmem>>, vector<16x128xbf16>,
    return
  }
  func.func @transform_0(%arg0: i32) -> (i32, i32) {
    %c0_i32 = arith.constant 0 : i32
    %c0_i32_0 = arith.constant 0 : i32
    return %arg0, %c0_i32 : i32, i32
  }
  func.func @transform_1(%arg0: i32) -> (i32, i32) {
    %c0_i32 = arith.constant 0 : i32
    %c0_i32_0 = arith.constant 0 : i32
    %c0_i32_1 = arith.constant 0 : i32
    return %c0_i32, %c0_i32_0 : i32, i32
  }
  func.func @transform_2(%arg0: i32) -> (i32, i32) {
    %c0_i32 = arith.constant 0 : i32
    %c0_i32_0 = arith.constant 0 : i32
    %c0_i32_1 = arith.constant 0 : i32
    return %c0_i32, %c0_i32_0 : i32, i32
  }
  func.func @transform_3(%arg0: i32) -> (i32, i32) {
    %c0_i32 = arith.constant 0 : i32
    %c0_i32_0 = arith.constant 0 : i32
    return %arg0, %c0_i32 : i32, i32
  }
}

module attributes {stable_mosaic.version = 11 : i64} {
  func.func @_conv_bias_stats_kernel(%arg0: i32, %arg1: memref<64x256xbf16, #tpu.memory_space<vmem>>, %arg2: memref<256x32xbf16, #tpu.memory_space<vmem>>, %arg3: memref<1x32xf32, #tpu.memory_space<vmem>>, %arg4: memref<64x32xf32, #tpu.memory_space<vmem>>, %arg5: memref<1x8x32xf32, #tpu.memory_space<vmem>>, %arg6: memref<1x8x32xf32, #tpu.memory_space<vmem>>) attributes {dimension_semantics = [#tpu.dimension_semantics<parallel>], iteration_bounds = array<i64: 1>, scalar_prefetch = 0 : i64, scratch_operands = 0 : i64, tpu.core_type = #tpu.core_type<tc>, window_params = [{transform_indices = @transform_0, window_bounds = array<i64: 64, 256>}, {pipeline_mode = #tpu.pipeline_mode<synchronous>, transform_indices = @transform_1, window_bounds = array<i64: 256, 32>}, {pipeline_mode = #tpu.pipeline_mode<synchronous>, transform_indices = @transform_2, window_bounds = array<i64: 1, 32>}, {transform_indices = @transform_3, window_bounds = array<i64: 64, 32>}, {transform_indices = @transform_4, window_bounds = array<i64: 1, 8, 32>}, {transform_indices = @transform_5, window_bounds = array<i64: 1, 8, 32>}]} {
    %c0 = arith.constant 0 : index
    %c0_0 = arith.constant 0 : index
    %0 = vector.load %arg1[%c0, %c0_0] : memref<64x256xbf16, #tpu.memory_space<vmem>>, vector<64x256xbf16>
    %c0_1 = arith.constant 0 : index
    %c0_2 = arith.constant 0 : index
    %1 = vector.load %arg2[%c0_1, %c0_2] : memref<256x32xbf16, #tpu.memory_space<vmem>>, vector<256x32xbf16>
    %cst = arith.constant dense<0.000000e+00> : vector<64x32xf32>
    %2 = tpu.matmul %0, %1, %cst {dimension_numbers = #tpu.dot_dimension_numbers<[1], [0], [0], [1], [0, 0, 1, 1], [], []>} : vector<64x256xbf16>, vector<256x32xbf16>, vector<64x32xf32> -> vector<64x32xf32>
    %c0_3 = arith.constant 0 : index
    %c0_4 = arith.constant 0 : index
    %3 = vector.load %arg3[%c0_3, %c0_4] : memref<1x32xf32, #tpu.memory_space<vmem>>, vector<1x32xf32>
    %4 = vector.broadcast %3 : vector<1x32xf32> to vector<64x32xf32>
    %5 = arith.addf %2, %4 : vector<64x32xf32>
    %c0_5 = arith.constant 0 : index
    %c0_6 = arith.constant 0 : index
    %6 = vector.load %arg4[%c0_5, %c0_6] : memref<64x32xf32, #tpu.memory_space<vmem>>, vector<64x32xf32>
    tpu.vector_store %arg4[%c0_5, %c0_6], %5 {strides = array<i32>} : memref<64x32xf32, #tpu.memory_space<vmem>>, vector<64x32xf32>,
    %cst_7 = arith.constant dense<0.000000e+00> : vector<32xf32>
    %7 = vector.multi_reduction <add>, %5, %cst_7 [0] : vector<64x32xf32> to vector<32xf32>
    %8 = vector.shape_cast %7 : vector<32xf32> to vector<1x32xf32>
    %9 = vector.shape_cast %8 : vector<1x32xf32> to vector<1x32xf32>
    %10 = vector.broadcast %9 : vector<1x32xf32> to vector<8x32xf32>
    %c0_8 = arith.constant 0 : index
    %c0_9 = arith.constant 0 : index
    %c0_10 = arith.constant 0 : index
    %11 = vector.load %arg5[%c0_8, %c0_9, %c0_10] : memref<1x8x32xf32, #tpu.memory_space<vmem>>, vector<1x8x32xf32>
    %12 = vector.shape_cast %11 : vector<1x8x32xf32> to vector<8x32xf32>
    %13 = vector.shape_cast %10 : vector<8x32xf32> to vector<1x8x32xf32>
    tpu.vector_store %arg5[%c0_8, %c0_9, %c0_10], %13 {strides = array<i32>} : memref<1x8x32xf32, #tpu.memory_space<vmem>>, vector<1x8x32xf32>,
    %14 = arith.mulf %5, %5 : vector<64x32xf32>
    %cst_11 = arith.constant dense<0.000000e+00> : vector<32xf32>
    %15 = vector.multi_reduction <add>, %14, %cst_11 [0] : vector<64x32xf32> to vector<32xf32>
    %16 = vector.shape_cast %15 : vector<32xf32> to vector<1x32xf32>
    %17 = vector.shape_cast %16 : vector<1x32xf32> to vector<1x32xf32>
    %18 = vector.broadcast %17 : vector<1x32xf32> to vector<8x32xf32>
    %c0_12 = arith.constant 0 : index
    %c0_13 = arith.constant 0 : index
    %c0_14 = arith.constant 0 : index
    %19 = vector.load %arg6[%c0_12, %c0_13, %c0_14] : memref<1x8x32xf32, #tpu.memory_space<vmem>>, vector<1x8x32xf32>
    %20 = vector.shape_cast %19 : vector<1x8x32xf32> to vector<8x32xf32>
    %21 = vector.shape_cast %18 : vector<8x32xf32> to vector<1x8x32xf32>
    tpu.vector_store %arg6[%c0_12, %c0_13, %c0_14], %21 {strides = array<i32>} : memref<1x8x32xf32, #tpu.memory_space<vmem>>, vector<1x8x32xf32>,
    return
  }
  func.func @transform_0(%arg0: i32) -> (i32, i32) {
    %c0_i32 = arith.constant 0 : i32
    %c0_i32_0 = arith.constant 0 : i32
    return %arg0, %c0_i32 : i32, i32
  }
  func.func @transform_1(%arg0: i32) -> (i32, i32) {
    %c0_i32 = arith.constant 0 : i32
    %c0_i32_0 = arith.constant 0 : i32
    %c0_i32_1 = arith.constant 0 : i32
    return %c0_i32, %c0_i32_0 : i32, i32
  }
  func.func @transform_2(%arg0: i32) -> (i32, i32) {
    %c0_i32 = arith.constant 0 : i32
    %c0_i32_0 = arith.constant 0 : i32
    %c0_i32_1 = arith.constant 0 : i32
    return %c0_i32, %c0_i32_0 : i32, i32
  }
  func.func @transform_3(%arg0: i32) -> (i32, i32) {
    %c0_i32 = arith.constant 0 : i32
    %c0_i32_0 = arith.constant 0 : i32
    return %arg0, %c0_i32 : i32, i32
  }
  func.func @transform_4(%arg0: i32) -> (i32, i32, i32) {
    %c0_i32 = arith.constant 0 : i32
    %c0_i32_0 = arith.constant 0 : i32
    %c0_i32_1 = arith.constant 0 : i32
    return %arg0, %c0_i32, %c0_i32_0 : i32, i32, i32
  }
  func.func @transform_5(%arg0: i32) -> (i32, i32, i32) {
    %c0_i32 = arith.constant 0 : i32
    %c0_i32_0 = arith.constant 0 : i32
    %c0_i32_1 = arith.constant 0 : i32
    return %arg0, %c0_i32, %c0_i32_0 : i32, i32, i32
  }
}

module attributes {stable_mosaic.version = 11 : i64} {
  func.func @_bn_lrelu_kernel(%arg0: i32, %arg1: memref<8x256xf32, #tpu.memory_space<vmem>>, %arg2: memref<1x256xf32, #tpu.memory_space<vmem>>, %arg3: memref<1x256xf32, #tpu.memory_space<vmem>>, %arg4: memref<8x256xbf16, #tpu.memory_space<vmem>>) attributes {dimension_semantics = [#tpu.dimension_semantics<parallel>], iteration_bounds = array<i64: 1>, scalar_prefetch = 0 : i64, scratch_operands = 0 : i64, tpu.core_type = #tpu.core_type<tc>, window_params = [{transform_indices = @transform_0, window_bounds = array<i64: 8, 256>}, {pipeline_mode = #tpu.pipeline_mode<synchronous>, transform_indices = @transform_1, window_bounds = array<i64: 1, 256>}, {pipeline_mode = #tpu.pipeline_mode<synchronous>, transform_indices = @transform_2, window_bounds = array<i64: 1, 256>}, {transform_indices = @transform_3, window_bounds = array<i64: 8, 256>}]} {
    %c0 = arith.constant 0 : index
    %c0_0 = arith.constant 0 : index
    %0 = vector.load %arg1[%c0, %c0_0] : memref<8x256xf32, #tpu.memory_space<vmem>>, vector<8x256xf32>
    %c0_1 = arith.constant 0 : index
    %c0_2 = arith.constant 0 : index
    %1 = vector.load %arg2[%c0_1, %c0_2] : memref<1x256xf32, #tpu.memory_space<vmem>>, vector<1x256xf32>
    %2 = vector.broadcast %1 : vector<1x256xf32> to vector<8x256xf32>
    %3 = arith.mulf %0, %2 : vector<8x256xf32>
    %c0_3 = arith.constant 0 : index
    %c0_4 = arith.constant 0 : index
    %4 = vector.load %arg3[%c0_3, %c0_4] : memref<1x256xf32, #tpu.memory_space<vmem>>, vector<1x256xf32>
    %5 = vector.broadcast %4 : vector<1x256xf32> to vector<8x256xf32>
    %6 = arith.addf %3, %5 : vector<8x256xf32>
    %cst = arith.constant 0.00999999977 : f32
    %7 = vector.broadcast %cst : f32 to vector<8x256xf32>
    %8 = arith.mulf %7, %6 : vector<8x256xf32>
    %9 = arith.maximumf %6, %8 : vector<8x256xf32>
    %10 = arith.truncf %9 : vector<8x256xf32> to vector<8x256xbf16>
    %c0_5 = arith.constant 0 : index
    %c0_6 = arith.constant 0 : index
    %11 = vector.load %arg4[%c0_5, %c0_6] : memref<8x256xbf16, #tpu.memory_space<vmem>>, vector<8x256xbf16>
    tpu.vector_store %arg4[%c0_5, %c0_6], %10 {strides = array<i32>} : memref<8x256xbf16, #tpu.memory_space<vmem>>, vector<8x256xbf16>,
    return
  }
  func.func @transform_0(%arg0: i32) -> (i32, i32) {
    %c0_i32 = arith.constant 0 : i32
    %c0_i32_0 = arith.constant 0 : i32
    return %arg0, %c0_i32 : i32, i32
  }
  func.func @transform_1(%arg0: i32) -> (i32, i32) {
    %c0_i32 = arith.constant 0 : i32
    %c0_i32_0 = arith.constant 0 : i32
    %c0_i32_1 = arith.constant 0 : i32
    return %c0_i32, %c0_i32_0 : i32, i32
  }
  func.func @transform_2(%arg0: i32) -> (i32, i32) {
    %c0_i32 = arith.constant 0 : i32
    %c0_i32_0 = arith.constant 0 : i32
    %c0_i32_1 = arith.constant 0 : i32
    return %c0_i32, %c0_i32_0 : i32, i32
  }
  func.func @transform_3(%arg0: i32) -> (i32, i32) {
    %c0_i32 = arith.constant 0 : i32
    %c0_i32_0 = arith.constant 0 : i32
    return %arg0, %c0_i32 : i32, i32
  }
}

module attributes {stable_mosaic.version = 11 : i64} {
  func.func @_conv_bias_stats_kernel(%arg0: i32, %arg1: memref<16x384xbf16, #tpu.memory_space<vmem>>, %arg2: memref<384x64xbf16, #tpu.memory_space<vmem>>, %arg3: memref<1x64xf32, #tpu.memory_space<vmem>>, %arg4: memref<16x64xf32, #tpu.memory_space<vmem>>, %arg5: memref<1x8x64xf32, #tpu.memory_space<vmem>>, %arg6: memref<1x8x64xf32, #tpu.memory_space<vmem>>) attributes {dimension_semantics = [#tpu.dimension_semantics<parallel>], iteration_bounds = array<i64: 1>, scalar_prefetch = 0 : i64, scratch_operands = 0 : i64, tpu.core_type = #tpu.core_type<tc>, window_params = [{transform_indices = @transform_0, window_bounds = array<i64: 16, 384>}, {pipeline_mode = #tpu.pipeline_mode<synchronous>, transform_indices = @transform_1, window_bounds = array<i64: 384, 64>}, {pipeline_mode = #tpu.pipeline_mode<synchronous>, transform_indices = @transform_2, window_bounds = array<i64: 1, 64>}, {transform_indices = @transform_3, window_bounds = array<i64: 16, 64>}, {transform_indices = @transform_4, window_bounds = array<i64: 1, 8, 64>}, {transform_indices = @transform_5, window_bounds = array<i64: 1, 8, 64>}]} {
    %c0 = arith.constant 0 : index
    %c0_0 = arith.constant 0 : index
    %0 = vector.load %arg1[%c0, %c0_0] : memref<16x384xbf16, #tpu.memory_space<vmem>>, vector<16x384xbf16>
    %c0_1 = arith.constant 0 : index
    %c0_2 = arith.constant 0 : index
    %1 = vector.load %arg2[%c0_1, %c0_2] : memref<384x64xbf16, #tpu.memory_space<vmem>>, vector<384x64xbf16>
    %cst = arith.constant dense<0.000000e+00> : vector<16x64xf32>
    %2 = tpu.matmul %0, %1, %cst {dimension_numbers = #tpu.dot_dimension_numbers<[1], [0], [0], [1], [0, 0, 1, 1], [], []>} : vector<16x384xbf16>, vector<384x64xbf16>, vector<16x64xf32> -> vector<16x64xf32>
    %c0_3 = arith.constant 0 : index
    %c0_4 = arith.constant 0 : index
    %3 = vector.load %arg3[%c0_3, %c0_4] : memref<1x64xf32, #tpu.memory_space<vmem>>, vector<1x64xf32>
    %4 = vector.broadcast %3 : vector<1x64xf32> to vector<16x64xf32>
    %5 = arith.addf %2, %4 : vector<16x64xf32>
    %c0_5 = arith.constant 0 : index
    %c0_6 = arith.constant 0 : index
    %6 = vector.load %arg4[%c0_5, %c0_6] : memref<16x64xf32, #tpu.memory_space<vmem>>, vector<16x64xf32>
    tpu.vector_store %arg4[%c0_5, %c0_6], %5 {strides = array<i32>} : memref<16x64xf32, #tpu.memory_space<vmem>>, vector<16x64xf32>,
    %cst_7 = arith.constant dense<0.000000e+00> : vector<64xf32>
    %7 = vector.multi_reduction <add>, %5, %cst_7 [0] : vector<16x64xf32> to vector<64xf32>
    %8 = vector.shape_cast %7 : vector<64xf32> to vector<1x64xf32>
    %9 = vector.shape_cast %8 : vector<1x64xf32> to vector<1x64xf32>
    %10 = vector.broadcast %9 : vector<1x64xf32> to vector<8x64xf32>
    %c0_8 = arith.constant 0 : index
    %c0_9 = arith.constant 0 : index
    %c0_10 = arith.constant 0 : index
    %11 = vector.load %arg5[%c0_8, %c0_9, %c0_10] : memref<1x8x64xf32, #tpu.memory_space<vmem>>, vector<1x8x64xf32>
    %12 = vector.shape_cast %11 : vector<1x8x64xf32> to vector<8x64xf32>
    %13 = vector.shape_cast %10 : vector<8x64xf32> to vector<1x8x64xf32>
    tpu.vector_store %arg5[%c0_8, %c0_9, %c0_10], %13 {strides = array<i32>} : memref<1x8x64xf32, #tpu.memory_space<vmem>>, vector<1x8x64xf32>,
    %14 = arith.mulf %5, %5 : vector<16x64xf32>
    %cst_11 = arith.constant dense<0.000000e+00> : vector<64xf32>
    %15 = vector.multi_reduction <add>, %14, %cst_11 [0] : vector<16x64xf32> to vector<64xf32>
    %16 = vector.shape_cast %15 : vector<64xf32> to vector<1x64xf32>
    %17 = vector.shape_cast %16 : vector<1x64xf32> to vector<1x64xf32>
    %18 = vector.broadcast %17 : vector<1x64xf32> to vector<8x64xf32>
    %c0_12 = arith.constant 0 : index
    %c0_13 = arith.constant 0 : index
    %c0_14 = arith.constant 0 : index
    %19 = vector.load %arg6[%c0_12, %c0_13, %c0_14] : memref<1x8x64xf32, #tpu.memory_space<vmem>>, vector<1x8x64xf32>
    %20 = vector.shape_cast %19 : vector<1x8x64xf32> to vector<8x64xf32>
    %21 = vector.shape_cast %18 : vector<8x64xf32> to vector<1x8x64xf32>
    tpu.vector_store %arg6[%c0_12, %c0_13, %c0_14], %21 {strides = array<i32>} : memref<1x8x64xf32, #tpu.memory_space<vmem>>, vector<1x8x64xf32>,
    return
  }
  func.func @transform_0(%arg0: i32) -> (i32, i32) {
    %c0_i32 = arith.constant 0 : i32
    %c0_i32_0 = arith.constant 0 : i32
    return %arg0, %c0_i32 : i32, i32
  }
  func.func @transform_1(%arg0: i32) -> (i32, i32) {
    %c0_i32 = arith.constant 0 : i32
    %c0_i32_0 = arith.constant 0 : i32
    %c0_i32_1 = arith.constant 0 : i32
    return %c0_i32, %c0_i32_0 : i32, i32
  }
  func.func @transform_2(%arg0: i32) -> (i32, i32) {
    %c0_i32 = arith.constant 0 : i32
    %c0_i32_0 = arith.constant 0 : i32
    %c0_i32_1 = arith.constant 0 : i32
    return %c0_i32, %c0_i32_0 : i32, i32
  }
  func.func @transform_3(%arg0: i32) -> (i32, i32) {
    %c0_i32 = arith.constant 0 : i32
    %c0_i32_0 = arith.constant 0 : i32
    return %arg0, %c0_i32 : i32, i32
  }
  func.func @transform_4(%arg0: i32) -> (i32, i32, i32) {
    %c0_i32 = arith.constant 0 : i32
    %c0_i32_0 = arith.constant 0 : i32
    %c0_i32_1 = arith.constant 0 : i32
    return %arg0, %c0_i32, %c0_i32_0 : i32, i32, i32
  }
  func.func @transform_5(%arg0: i32) -> (i32, i32, i32) {
    %c0_i32 = arith.constant 0 : i32
    %c0_i32_0 = arith.constant 0 : i32
    %c0_i32_1 = arith.constant 0 : i32
    return %arg0, %c0_i32, %c0_i32_0 : i32, i32, i32
  }
}

module attributes {stable_mosaic.version = 11 : i64} {
  func.func @_bn_lrelu_kernel(%arg0: i32, %arg1: memref<2x512xf32, #tpu.memory_space<vmem>>, %arg2: memref<1x512xf32, #tpu.memory_space<vmem>>, %arg3: memref<1x512xf32, #tpu.memory_space<vmem>>, %arg4: memref<2x512xbf16, #tpu.memory_space<vmem>>) attributes {dimension_semantics = [#tpu.dimension_semantics<parallel>], iteration_bounds = array<i64: 1>, scalar_prefetch = 0 : i64, scratch_operands = 0 : i64, tpu.core_type = #tpu.core_type<tc>, window_params = [{transform_indices = @transform_0, window_bounds = array<i64: 2, 512>}, {pipeline_mode = #tpu.pipeline_mode<synchronous>, transform_indices = @transform_1, window_bounds = array<i64: 1, 512>}, {pipeline_mode = #tpu.pipeline_mode<synchronous>, transform_indices = @transform_2, window_bounds = array<i64: 1, 512>}, {transform_indices = @transform_3, window_bounds = array<i64: 2, 512>}]} {
    %c0 = arith.constant 0 : index
    %c0_0 = arith.constant 0 : index
    %0 = vector.load %arg1[%c0, %c0_0] : memref<2x512xf32, #tpu.memory_space<vmem>>, vector<2x512xf32>
    %c0_1 = arith.constant 0 : index
    %c0_2 = arith.constant 0 : index
    %1 = vector.load %arg2[%c0_1, %c0_2] : memref<1x512xf32, #tpu.memory_space<vmem>>, vector<1x512xf32>
    %2 = vector.broadcast %1 : vector<1x512xf32> to vector<2x512xf32>
    %3 = arith.mulf %0, %2 : vector<2x512xf32>
    %c0_3 = arith.constant 0 : index
    %c0_4 = arith.constant 0 : index
    %4 = vector.load %arg3[%c0_3, %c0_4] : memref<1x512xf32, #tpu.memory_space<vmem>>, vector<1x512xf32>
    %5 = vector.broadcast %4 : vector<1x512xf32> to vector<2x512xf32>
    %6 = arith.addf %3, %5 : vector<2x512xf32>
    %cst = arith.constant 0.00999999977 : f32
    %7 = vector.broadcast %cst : f32 to vector<2x512xf32>
    %8 = arith.mulf %7, %6 : vector<2x512xf32>
    %9 = arith.maximumf %6, %8 : vector<2x512xf32>
    %10 = arith.truncf %9 : vector<2x512xf32> to vector<2x512xbf16>
    %c0_5 = arith.constant 0 : index
    %c0_6 = arith.constant 0 : index
    %11 = vector.load %arg4[%c0_5, %c0_6] : memref<2x512xbf16, #tpu.memory_space<vmem>>, vector<2x512xbf16>
    tpu.vector_store %arg4[%c0_5, %c0_6], %10 {strides = array<i32>} : memref<2x512xbf16, #tpu.memory_space<vmem>>, vector<2x512xbf16>,
    return
  }
  func.func @transform_0(%arg0: i32) -> (i32, i32) {
    %c0_i32 = arith.constant 0 : i32
    %c0_i32_0 = arith.constant 0 : i32
    return %arg0, %c0_i32 : i32, i32
  }
  func.func @transform_1(%arg0: i32) -> (i32, i32) {
    %c0_i32 = arith.constant 0 : i32
    %c0_i32_0 = arith.constant 0 : i32
    %c0_i32_1 = arith.constant 0 : i32
    return %c0_i32, %c0_i32_0 : i32, i32
  }
  func.func @transform_2(%arg0: i32) -> (i32, i32) {
    %c0_i32 = arith.constant 0 : i32
    %c0_i32_0 = arith.constant 0 : i32
    %c0_i32_1 = arith.constant 0 : i32
    return %c0_i32, %c0_i32_0 : i32, i32
  }
  func.func @transform_3(%arg0: i32) -> (i32, i32) {
    %c0_i32 = arith.constant 0 : i32
    %c0_i32_0 = arith.constant 0 : i32
    return %arg0, %c0_i32 : i32, i32
  }
}

module attributes {stable_mosaic.version = 11 : i64} {
  func.func @_linear_reparam_kernel(%arg0: i32, %arg1: memref<4x128xbf16, #tpu.memory_space<vmem>>, %arg2: memref<128x16xbf16, #tpu.memory_space<vmem>>, %arg3: memref<1x16xf32, #tpu.memory_space<vmem>>, %arg4: memref<4x8xf32, #tpu.memory_space<vmem>>, %arg5: memref<4x8xf32, #tpu.memory_space<vmem>>, %arg6: memref<4x8xf32, #tpu.memory_space<vmem>>, %arg7: memref<4x8xf32, #tpu.memory_space<vmem>>, %arg8: memref<4x16xf32, #tpu.memory_space<vmem>>) attributes {dimension_semantics = [#tpu.dimension_semantics<arbitrary>], iteration_bounds = array<i64: 2>, scalar_prefetch = 0 : i64, scratch_operands = 1 : i64, tpu.core_type = #tpu.core_type<tc>, window_params = [{transform_indices = @transform_0, window_bounds = array<i64: 4, 128>}, {transform_indices = @transform_1, window_bounds = array<i64: 128, 16>}, {pipeline_mode = #tpu.pipeline_mode<synchronous>, transform_indices = @transform_2, window_bounds = array<i64: 1, 16>}, {pipeline_mode = #tpu.pipeline_mode<synchronous>, transform_indices = @transform_3, window_bounds = array<i64: 4, 8>}, {pipeline_mode = #tpu.pipeline_mode<synchronous>, transform_indices = @transform_4, window_bounds = array<i64: 4, 8>}, {pipeline_mode = #tpu.pipeline_mode<synchronous>, transform_indices = @transform_5, window_bounds = array<i64: 4, 8>}, {pipeline_mode = #tpu.pipeline_mode<synchronous>, transform_indices = @transform_6, window_bounds = array<i64: 4, 8>}]} {
    %c0_i32 = arith.constant 0 : i32
    %0 = arith.cmpi eq, %arg0, %c0_i32 : i32
    %1 = arith.extui %0 : i1 to i32
    %c0_i32_0 = arith.constant 0 : i32
    %2 = arith.cmpi ne, %1, %c0_i32_0 : i32
    scf.if %2 {
      %cst_9 = arith.constant 0.000000e+00 : f32
      %12 = vector.broadcast %cst_9 : f32 to vector<4x16xf32>
      %c0_10 = arith.constant 0 : index
      %c0_11 = arith.constant 0 : index
      %13 = vector.load %arg8[%c0_10, %c0_11] : memref<4x16xf32, #tpu.memory_space<vmem>>, vector<4x16xf32>
      tpu.vector_store %arg8[%c0_10, %c0_11], %12 {strides = array<i32>} : memref<4x16xf32, #tpu.memory_space<vmem>>, vector<4x16xf32>,
    } else {
    }
    %c0 = arith.constant 0 : index
    %c0_1 = arith.constant 0 : index
    %3 = vector.load %arg8[%c0, %c0_1] : memref<4x16xf32, #tpu.memory_space<vmem>>, vector<4x16xf32>
    %c0_2 = arith.constant 0 : index
    %c0_3 = arith.constant 0 : index
    %4 = vector.load %arg1[%c0_2, %c0_3] : memref<4x128xbf16, #tpu.memory_space<vmem>>, vector<4x128xbf16>
    %c0_4 = arith.constant 0 : index
    %c0_5 = arith.constant 0 : index
    %5 = vector.load %arg2[%c0_4, %c0_5] : memref<128x16xbf16, #tpu.memory_space<vmem>>, vector<128x16xbf16>
    %cst = arith.constant dense<0.000000e+00> : vector<4x16xf32>
    %6 = tpu.matmul %4, %5, %cst {dimension_numbers = #tpu.dot_dimension_numbers<[1], [0], [0], [1], [0, 0, 1, 1], [], []>} : vector<4x128xbf16>, vector<128x16xbf16>, vector<4x16xf32> -> vector<4x16xf32>
    %7 = arith.addf %3, %6 : vector<4x16xf32>
    %c0_6 = arith.constant 0 : index
    %c0_7 = arith.constant 0 : index
    %8 = vector.load %arg8[%c0_6, %c0_7] : memref<4x16xf32, #tpu.memory_space<vmem>>, vector<4x16xf32>
    tpu.vector_store %arg8[%c0_6, %c0_7], %7 {strides = array<i32>} : memref<4x16xf32, #tpu.memory_space<vmem>>, vector<4x16xf32>,
    %c1_i32 = arith.constant 1 : i32
    %9 = arith.cmpi eq, %arg0, %c1_i32 : i32
    %10 = arith.extui %9 : i1 to i32
    %c0_i32_8 = arith.constant 0 : i32
    %11 = arith.cmpi ne, %10, %c0_i32_8 : i32
    scf.if %11 {
      %c0_9 = arith.constant 0 : index
      %c0_10 = arith.constant 0 : index
      %12 = vector.load %arg8[%c0_9, %c0_10] : memref<4x16xf32, #tpu.memory_space<vmem>>, vector<4x16xf32>
      %c0_11 = arith.constant 0 : index
      %c0_12 = arith.constant 0 : index
      %13 = vector.load %arg3[%c0_11, %c0_12] : memref<1x16xf32, #tpu.memory_space<vmem>>, vector<1x16xf32>
      %14 = vector.broadcast %13 : vector<1x16xf32> to vector<4x16xf32>
      %15 = arith.addf %12, %14 : vector<4x16xf32>
      %16 = vector.extract_strided_slice %15 {offsets = [0, 0], sizes = [4, 8], strides = [1, 1]} : vector<4x16xf32> to vector<4x8xf32>
      %17 = vector.extract_strided_slice %15 {offsets = [0, 8], sizes = [4, 8], strides = [1, 1]} : vector<4x16xf32> to vector<4x8xf32>
      %c0_13 = arith.constant 0 : index
      %c0_14 = arith.constant 0 : index
      %18 = vector.load %arg5[%c0_13, %c0_14] : memref<4x8xf32, #tpu.memory_space<vmem>>, vector<4x8xf32>
      tpu.vector_store %arg5[%c0_13, %c0_14], %16 {strides = array<i32>} : memref<4x8xf32, #tpu.memory_space<vmem>>, vector<4x8xf32>,
      %c0_15 = arith.constant 0 : index
      %c0_16 = arith.constant 0 : index
      %19 = vector.load %arg6[%c0_15, %c0_16] : memref<4x8xf32, #tpu.memory_space<vmem>>, vector<4x8xf32>
      tpu.vector_store %arg6[%c0_15, %c0_16], %17 {strides = array<i32>} : memref<4x8xf32, #tpu.memory_space<vmem>>, vector<4x8xf32>,
      %cst_17 = arith.constant 5.000000e-01 : f32
      %20 = vector.broadcast %cst_17 : f32 to vector<4x8xf32>
      %21 = arith.mulf %20, %17 : vector<4x8xf32>
      %22 = math.exp %21 : vector<4x8xf32>
      %c0_18 = arith.constant 0 : index
      %c0_19 = arith.constant 0 : index
      %23 = vector.load %arg4[%c0_18, %c0_19] : memref<4x8xf32, #tpu.memory_space<vmem>>, vector<4x8xf32>
      %24 = arith.mulf %22, %23 : vector<4x8xf32>
      %25 = arith.addf %16, %24 : vector<4x8xf32>
      %c0_20 = arith.constant 0 : index
      %c0_21 = arith.constant 0 : index
      %26 = vector.load %arg7[%c0_20, %c0_21] : memref<4x8xf32, #tpu.memory_space<vmem>>, vector<4x8xf32>
      tpu.vector_store %arg7[%c0_20, %c0_21], %25 {strides = array<i32>} : memref<4x8xf32, #tpu.memory_space<vmem>>, vector<4x8xf32>,
    } else {
    }
    return
  }
  func.func @transform_0(%arg0: i32) -> (i32, i32) {
    %c0_i32 = arith.constant 0 : i32
    %c0_i32_0 = arith.constant 0 : i32
    return %c0_i32, %arg0 : i32, i32
  }
  func.func @transform_1(%arg0: i32) -> (i32, i32) {
    %c0_i32 = arith.constant 0 : i32
    %c0_i32_0 = arith.constant 0 : i32
    return %arg0, %c0_i32 : i32, i32
  }
  func.func @transform_2(%arg0: i32) -> (i32, i32) {
    %c0_i32 = arith.constant 0 : i32
    %c0_i32_0 = arith.constant 0 : i32
    %c0_i32_1 = arith.constant 0 : i32
    return %c0_i32, %c0_i32_0 : i32, i32
  }
  func.func @transform_3(%arg0: i32) -> (i32, i32) {
    %c0_i32 = arith.constant 0 : i32
    %c0_i32_0 = arith.constant 0 : i32
    %c0_i32_1 = arith.constant 0 : i32
    return %c0_i32, %c0_i32_0 : i32, i32
  }
  func.func @transform_4(%arg0: i32) -> (i32, i32) {
    %c0_i32 = arith.constant 0 : i32
    %c0_i32_0 = arith.constant 0 : i32
    %c0_i32_1 = arith.constant 0 : i32
    return %c0_i32, %c0_i32_0 : i32, i32
  }
  func.func @transform_5(%arg0: i32) -> (i32, i32) {
    %c0_i32 = arith.constant 0 : i32
    %c0_i32_0 = arith.constant 0 : i32
    %c0_i32_1 = arith.constant 0 : i32
    return %c0_i32, %c0_i32_0 : i32, i32
  }
  func.func @transform_6(%arg0: i32) -> (i32, i32) {
    %c0_i32 = arith.constant 0 : i32
    %c0_i32_0 = arith.constant 0 : i32
    %c0_i32_1 = arith.constant 0 : i32
    return %c0_i32, %c0_i32_0 : i32, i32
  }
}

</mosaic_0001>

<bundles_post_ra>
// kernel: tile.33
= control target key start
LH: loop header
LB: loop body
LE: loop exit
PB: predicated region body
PF: predicated region fallthrough
CT: control target
= control target key end

     0   :  { %s22_s0 = inlined_call_operand.vmem [shape: f32[16], index: 0, kind: input, shape index: {}]   ;;  %s23_s1 = inlined_call_operand.vmem [shape: f32[8,16], index: 1, kind: output, shape index: {}]  }
   0x1   :  { %v4_v0 = vld [vmem:[%s22_s0] ss:$0 sm:$0xff] }
   0x2   :  { %5 = vst [vmem:[%s23_s1] sm:$0xff] %v4_v0 }

// kernel: tile.34
= control target key start
LH: loop header
LB: loop body
LE: loop exit
PB: predicated region body
PF: predicated region fallthrough
CT: control target
= control target key end

     0   :  { %s69_s10 = smov 112   ;;  %s70_s11 = smov 80   ;;  %vm3_vm0 = vcmask 130048   ;;  %vm9_vm1 = vcmask 1048448   ;;  %vm15_vm2 = vcmask 917248   ;;  %vm21_vm3 = vcmask 786048   ;;  %s113_s0 = inlined_call_operand.vmem [shape: f32[8,16], index: 0, kind: input, shape index: {}]   ;;  %s114_s1 = inlined_call_operand.vmem [shape: f32[1,128], index: 1, kind: output, shape index: {}]  }
   0x1   :  { %v55_v0 = vld [vmem:[%s113_s0 + $0x7] sm:$0x1]   ;;  %v57_v1 = vld [vmem:[%s113_s0 + $0x5] sm:$0x1]   ;;  %v56_v2 = vld [vmem:[%s113_s0 + $0x6] sm:$0x1]  }
   0x2   :  { %7 = vrot.lane.b32.xlu0 %v55_v0, %s69_s10  ;;  %19 = vrot.lane.b32.xlu1 %v57_v1, %s70_s11  ;;  %v58_v3 = vld [vmem:[%s113_s0 + $0x4] sm:$0x1]   ;;  %v2_v4 = vld [vmem:[%s113_s0] sm:$0x1]   ;;  %s71_s18 = smov 96   ;;  %s72_s19 = smov 64  }
   0x3   :  { %4 = vst.msk [vmem:[#allocation0] sm:$0x1] %vm3_vm0, %v2_v4   ;;  %v59_v5 = vld [vmem:[%s113_s0 + $0x3] sm:$0x1]   ;;  %v60_v6 = vld [vmem:[%s113_s0 + $0x2] sm:$0x1]  }
   0x4   :  { %s73_s24 = smov 48   ;;  %s74_s25 = smov 32   ;;  %v61_v7 = vld [vmem:[%s113_s0 + $0x1] sm:$0x1]   ;;  %vm27_vm4 = vcmask 654848   ;;  %vm33_vm5 = vcmask 523648  }
   0x5   :  { %s75_s0 = smov 16   ;;  %vm39_vm6 = vcmask 392448   ;;  %vm45_vm7 = vcmask 261248  }
   0x6   :  { %13 = vrot.lane.b32.xlu0 %v56_v2, %s71_s18  ;;  %25 = vrot.lane.b32.xlu1 %v58_v3, %s72_s19 }
   0xa   :  { %31 = vrot.lane.b32.xlu0 %v59_v5, %s73_s24  ;;  %37 = vrot.lane.b32.xlu1 %v60_v6, %s74_s25 }
   0xe   :  { %43 = vrot.lane.b32.xlu0 %v61_v7, %s75_s0 }
  0x74   :  { %v8_v8 = vpop.permute.xlu0 %7   ;;  %v20_v9 = vpop.permute.xlu1 %19  }
  0x75   :  { %10 = vst.msk [vmem:[#allocation0] sm:$0x1] %vm9_vm1, %v8_v8  }
  0x78   :  { %v14_v10 = vpop.permute.xlu0 %13   ;;  %v26_v11 = vpop.permute.xlu1 %25  }
  0x79   :  { %16 = vst.msk [vmem:[#allocation0] sm:$0x1] %vm15_vm2, %v14_v10  }
  0x7a   :  { %22 = vst.msk [vmem:[#allocation0] sm:$0x1] %vm21_vm3, %v20_v9  }
  0x7b   :  { %28 = vst.msk [vmem:[#allocation0] sm:$0x1] %vm27_vm4, %v26_v11  }
  0x7c   :  { %v32_v12 = vpop.permute.xlu0 %31   ;;  %v38_v13 = vpop.permute.xlu1 %37  }
  0x7d   :  { %34 = vst.msk [vmem:[#allocation0] sm:$0x1] %vm33_vm5, %v32_v12  }
  0x7e   :  { %40 = vst.msk [vmem:[#allocation0] sm:$0x1] %vm39_vm6, %v38_v13  }
  0x80   :  { %v44_v14 = vpop.permute.xlu0 %43  }
  0x81   :  { %46 = vst.msk [vmem:[#allocation0] sm:$0x1] %vm45_vm7, %v44_v14  }
  0x88   :  { %v51_v15 = vld [vmem:[#allocation0] sm:$0x1] }
  0x89   :  { %54 = vst [vmem:[%s114_s1] sm:$0x1] %v51_v15 }

// kernel: encoder_forward.8
= control target key start
LH: loop header
LB: loop body
LE: loop exit
PB: predicated region body
PF: predicated region fallthrough
CT: control target
= control target key end

     0   :  { %s322_s12 = smov 0   ;;  %s345_s0 = inlined_call_operand.vmem [shape: f32[32,128], index: 0, kind: input, shape index: {}]   ;;  %s346_s1 = inlined_call_operand.vmem [shape: f32[1,128], index: 1, kind: input, shape index: {}]   ;;  %s347_s2 = inlined_call_operand.vmem [shape: f32[1,128], index: 2, kind: input, shape index: {}]   ;;  %s348_s3 = inlined_call_operand.vmem [shape: bf16[32,128], index: 3, kind: output, shape index: {}]  }
   0x1 LB: > { %s264_s13 = sadd.s32 4294967295, %s300_s12   ;;  %p268_p0 = scmp.ge.s32.totalorder %s300_s12, 1  ;;  %s300_s12 = sphi %s322_s12, %s13_s12  }
   0x2   : > { %p138_p1 = scmp.lt.s32.totalorder %s300_s12, 3 }
   0x4   : > { %p139_p2 = pnand %p268_p0, %p138_p1 }
   0x5   : > { %s269_s14 = sshll.u32 (!%p139_p2), %s264_s13, 1 }
   0x6   : > { %142 = sbr.rel (%p139_p2) target bundleno = 26 (0x1a), region = 32  ;;  %p163_p3 = scmp.lt.s32.totalorder (!%p139_p2), %s269_s14, 3 }
   0xb   : > { %s350_s14 = smov (!%p163_p3, %s269_s14), 3  ;;  %v273_v0 = vld [vmem:[%s346_s1] ss:$0 sm:$0xff] }
   0xc   : > { %s270_s15 = sshll.u32 %s350_s14, 3  ;;  %v274_v3 = vld [vmem:[%s347_s2] ss:$0 sm:$0xff]  ;;  %s272_s23 = sshll.u32 %s350_s14, 2 }
   0xd   : > { %s166_s20 = scalar_lea.vmem %s345_s0, %s270_s15  ;;  %s172_s26 = scalar_lea.vmem %s348_s3, %s272_s23 }
   0xe   : > { %v174_v1 = vld [vmem:[%s166_s20] sm:$0xff]  ;;  %v175_v2 = vld [vmem:[%s166_s20 + $0x8] sm:$0xff] }
   0xf   : > { %v183_v4 = vmul.f32 %v273_v0, %v174_v1  ;;  %v184_v5 = vmul.f32 %v273_v0, %v175_v2 }
  0x11   : > { %v192_v6 = vadd.f32 %v274_v3, %v183_v4  ;;  %v193_v7 = vadd.f32 %v274_v3, %v184_v5 }
  0x13   : > { %v194_v8 = vmul.f32 0.01, %v192_v6  ;;  %v195_v9 = vmul.f32 0.01, %v193_v7 }
  0x15   : > { %v196_v10 = vmax.f32 %v192_v6, %v194_v8  ;;  %v197_v11 = vmax.f32 %v193_v7, %v195_v9 }
  0x17   : > { %v284_v12 = vpack.c.bf16 %v197_v11, %v196_v10 }
  0x19   : > { %285 = vst [vmem:[%s172_s26] sm:$0xff] %v284_v12  }
  0x1a PF: > { %s13_s12 = sadd.s32 1, %s300_s12  }
  0x1b   : > { %p10_p4 = scmp.ge.s32.totalorder %s13_s12, 4  }
  0x1d   :  { %12 = sbr.rel (!%p10_p4) target bundleno = 1 (0x1), region = 62 }

// kernel: encoder_forward.7
= control target key start
LH: loop header
LB: loop body
LE: loop exit
PB: predicated region body
PF: predicated region fallthrough
CT: control target
= control target key end

     0   :  { %s733_s18 = smov 0   ;;  %s834_s0 = inlined_call_operand.vmem [shape: bf16[256,128], index: 0, kind: input, shape index: {}]   ;;  %s835_s1 = inlined_call_operand.vmem [shape: bf16[128,16], index: 1, kind: input, shape index: {}]   ;;  %s836_s2 = inlined_call_operand.vmem [shape: f32[1,16], index: 2, kind: input, shape index: {}]   ;;  %s837_s3 = inlined_call_operand.vmem [shape: f32[256,16], index: 3, kind: output, shape index: {0}]   ;;  %s838_s4 = inlined_call_operand.vmem [shape: f32[4,8,16], index: 4, kind: output, shape index: {1}]   ;;  %s839_s5 = inlined_call_operand.vmem [shape: f32[4,8,16], index: 5, kind: output, shape index: {2}]  }
   0x1 LB: > { %s739_s19 = sadd.s32 4294967295, %s701_s18   ;;  %p601_p0 = scmp.ge.s32.totalorder %s701_s18, 1  ;;  %s701_s18 = sphi %s733_s18, %s16_s18  }
   0x2   : > { %p193_p1 = scmp.lt.s32.totalorder %s701_s18, 5 }
   0x4   : > { %p194_p2 = pnand %p601_p0, %p193_p1 }
   0x5   : > { %s602_s22 = sshll.u32 (!%p194_p2), %s739_s19, 3  ;;  %p241_p4 = scmp.lt.s32.totalorder (!%p194_p2), %s739_s19, 3 }
   0x6   : > { %197 = sbr.rel (%p194_p2) target bundleno = 275 (0x113), region = 32  ;;  %p230_p3 = scmp.lt.s32.totalorder (!%p194_p2), %s602_s22, 31 }
   0xb   : > { %v683_v0 = vld [vmem:[%s835_s1 + $0x38] sm:$0xff]   ;;  %v684_v1 = vld [vmem:[%s835_s1 + $0x30] sm:$0xff]   ;;  %s841_s22 = smov (!%p230_p3, %s602_s22), 31  ;;  %v685_v2 = vld [vmem:[%s835_s1 + $0x28] sm:$0xff]   ;;  %vm418_vm0 = vcmask 130048   ;;  %s843_s19 = smov (!%p241_p4, %s739_s19), 3 }
   0xc   : > { %635 = vmatprep.subr.bf16.mxu0 %v683_v0  ;;  %659 = vmatprep.subr.bf16.mxu1 %v683_v0  ;;  %s603_s27 = sshll.u32 %s841_s22, 2  ;;  %v686_v3 = vld [vmem:[%s835_s1 + $0x20] sm:$0xff]   ;;  %v687_v6 = vld [vmem:[%s835_s1 + $0x18] sm:$0xff]   ;;  %v688_v7 = vld [vmem:[%s835_s1 + $0x10] sm:$0xff]   ;;  %s605_s16 = sshll.u32 %s841_s22, 3 }
   0xd   : > { %636 = vmatpush3.bf16.msra.mxu0 %v683_v0  ;;  %667 = vmatpush3.bf16.msra.mxu1 %v683_v0  ;;  %s759_s30 = scalar_lea.vmem %s834_s0, %s603_s27  ;;  %v689_v8 = vld [vmem:[%s835_s1 + $0x8] sm:$0xff]   ;;  %v690_v9 = vld [vmem:[%s835_s1] sm:$0xff]   ;;  %s787_s24 = scalar_lea.vmem %s837_s3, %s605_s16 }
   0xe   : > { %637 = vmatprep.subr.bf16.mxu0 %v684_v1  ;;  %660 = vmatprep.subr.bf16.mxu1 %v684_v1  ;;  %v691_v4 = vld [vmem:[%s759_s30] sm:$0xff]   ;;  %v693_v5 = vld [vmem:[%s759_s30 + $0x10] sm:$0xff]   ;;  %v692_v10 = vld [vmem:[%s759_s30 + $0x8] sm:$0xff]   ;;  %s606_s22 = sshll.u32 %s843_s19, 3 }
   0xf   : > { %651 = vmatprep.mubr.bf16.mxu0 %v691_v4  ;;  %655 = vmatprep.mubr.bf16.mxu1 %v693_v5  ;;  %v694_v11 = vld [vmem:[%s759_s30 + $0x18] sm:$0xff]   ;;  %v608_v12 = vld [vmem:[%s836_s2] ss:$0 sm:$0xff]  ;;  %s244_s27 = scalar_lea.vmem %s838_s4, %s606_s22  ;;  %s248_s30 = scalar_lea.vmem %s839_s5, %s606_s22 }
  0x11   : > { %638 = vmatpush3.bf16.msra.mxu0 %v684_v1  ;;  %668 = vmatpush3.bf16.msra.mxu1 %v684_v1 }
  0x12   : > { %639 = vmatprep.subr.bf16.mxu0 %v685_v2  ;;  %661 = vmatprep.subr.bf16.mxu1 %v685_v2 }
  0x15   : > { %640 = vmatpush3.bf16.msra.mxu0 %v685_v2  ;;  %669 = vmatpush3.bf16.msra.mxu1 %v685_v2 }
  0x16   : > { %641 = vmatprep.subr.bf16.mxu0 %v686_v3  ;;  %662 = vmatprep.subr.bf16.mxu1 %v686_v3 }
  0x19   : > { %642 = vmatpush3.bf16.msra.mxu0 %v686_v3  ;;  %670 = vmatpush3.bf16.msra.mxu1 %v686_v3 }
  0x1a   : > { %643 = vmatprep.subr.bf16.mxu0 %v687_v6  ;;  %663 = vmatprep.subr.bf16.mxu1 %v687_v6 }
  0x1d   : > { %644 = vmatpush3.bf16.msra.mxu0 %v687_v6  ;;  %671 = vmatpush3.bf16.msra.mxu1 %v687_v6 }
  0x1e   : > { %645 = vmatprep.subr.bf16.mxu0 %v688_v7  ;;  %664 = vmatprep.subr.bf16.mxu1 %v688_v7 }
  0x21   : > { %646 = vmatpush3.bf16.msra.mxu0 %v688_v7  ;;  %672 = vmatpush3.bf16.msra.mxu1 %v688_v7 }
  0x22   : > { %647 = vmatprep.subr.bf16.mxu0 %v689_v8  ;;  %665 = vmatprep.subr.bf16.mxu1 %v689_v8 }
  0x25   : > { %648 = vmatpush3.bf16.msra.mxu0 %v689_v8  ;;  %673 = vmatpush3.bf16.msra.mxu1 %v689_v8 }
  0x26   : > { %649 = vmatprep.subr.bf16.mxu0 %v690_v9  ;;  %666 = vmatprep.subr.bf16.mxu1 %v690_v9 }
  0x29   : > { %650 = vmatpush3.bf16.msra.mxu0 %v690_v9  ;;  %674 = vmatpush3.bf16.msra.mxu1 %v690_v9 }
  0x2c   : > { %652 = vmatmul.mubr.bf16.vlgmr.msra.gmra.mxu0 %v692_v10  ;;  %656 = vmatmul.mubr.bf16.vlgmr.msra.gmra.mxu1 %v694_v11 }
  0xec   : > { %v653_v13 = vpop.f32.mrf.mxu0  ;;  %v657_v14 = vpop.f32.mrf.mxu1 }
  0xed   : > { %v396_v15 = vadd.f32 %v653_v13, %v608_v12  ;;  %v412_v16 = vadd.f32 %v657_v14, %v608_v12 }
  0xee   : > { %v387_v17 = vpop.f32.mrf.mxu0  ;;  %v403_v18 = vpop.f32.mrf.mxu1 }
  0xef   : > { %421 = vst.msk [vmem:[%s787_s24 + $0x10] sm:$0xff] %vm418_vm0, %v396_v15  ;;  %v388_v19 = vadd.f32 %v608_v12, %v387_v17  ;;  %425 = vst.msk [vmem:[%s787_s24 + $0x30] sm:$0xff] %vm418_vm0, %v412_v16  ;;  %v404_v21 = vadd.f32 %v608_v12, %v403_v18  ;;  %v451_v30 = vmul.f32 %v396_v15, %v396_v15  ;;  %v430_v35 = vsel %vm418_vm0, %v396_v15, 0.0 }
  0xf0   : > { %v654_v20 = vpop.f32.mrf.mxu0  ;;  %v658_v22 = vpop.f32.mrf.mxu1  ;;  %v455_v51 = vmul.f32 %v412_v16, %v412_v16  ;;  %v438_v56 = vsel %vm418_vm0, %v412_v16, 0.0 }
  0xf1   : > { %419 = vst.msk [vmem:[%s787_s24] sm:$0xff] %vm418_vm0, %v388_v19  ;;  %v399_v23 = vadd.f32 %v654_v20, %v608_v12  ;;  %423 = vst.msk [vmem:[%s787_s24 + $0x20] sm:$0xff] %vm418_vm0, %v404_v21  ;;  %v415_v25 = vadd.f32 %v658_v22, %v608_v12  ;;  %v449_v27 = vmul.f32 %v388_v19, %v388_v19  ;;  %v427_v31 = vsel %vm418_vm0, %v388_v19, 0.0 }
  0xf2   : > { %v390_v24 = vpop.f32.mrf.mxu0  ;;  %v406_v26 = vpop.f32.mrf.mxu1  ;;  %v460_v41 = vsel %vm418_vm0, %v451_v30, 0.0  ;;  %v453_v43 = vmul.f32 %v404_v21, %v404_v21  ;;  %v434_v47 = vsel %vm418_vm0, %v404_v21, 0.0  ;;  %v468_v61 = vsel %vm418_vm0, %v455_v51, 0.0 }
  0xf3   : > { %422 = vst.msk [vmem:[%s787_s24 + $0x18] sm:$0xff] %vm418_vm0, %v399_v23  ;;  %v391_v28 = vadd.f32 %v608_v12, %v390_v24  ;;  %426 = vst.msk [vmem:[%s787_s24 + $0x38] sm:$0xff] %vm418_vm0, %v415_v25  ;;  %v407_v29 = vadd.f32 %v608_v12, %v406_v26  ;;  %v457_v36 = vsel %vm418_vm0, %v449_v27, 0.0  ;;  %v452_v37 = vmul.f32 %v399_v23, %v399_v23 }
  0xf4   : > { %v432_v42 = vsel %vm418_vm0, %v399_v23, 0.0  ;;  %v464_v52 = vsel %vm418_vm0, %v453_v43, 0.0  ;;  %v456_v57 = vmul.f32 %v415_v25, %v415_v25  ;;  %v440_v62 = vsel %vm418_vm0, %v415_v25, 0.0 }
  0xf5   : > { %420 = vst.msk [vmem:[%s787_s24 + $0x8] sm:$0xff] %vm418_vm0, %v391_v28  ;;  %v428_v32 = vsel %vm418_vm0, %v391_v28, 0.0  ;;  %v450_v33 = vmul.f32 %v391_v28, %v391_v28  ;;  %424 = vst.msk [vmem:[%s787_s24 + $0x28] sm:$0xff] %vm418_vm0, %v407_v29  ;;  %v462_v46 = vsel %vm418_vm0, %v452_v37, 0.0  ;;  %v454_v48 = vmul.f32 %v407_v29, %v407_v29 }
  0xf6   : > { %v429_v34 = vadd.f32 %v428_v32, %v427_v31  ;;  %v436_v53 = vsel %vm418_vm0, %v407_v29, 0.0  ;;  %v470_v1 = vsel %vm418_vm0, %v456_v57, 0.0 }
  0xf7   : > { %v458_v38 = vsel %vm418_vm0, %v450_v33, 0.0  ;;  %v466_v58 = vsel %vm418_vm0, %v454_v48, 0.0 }
  0xf8   : > { %v431_v39 = vadd.f32 %v430_v35, %v429_v34  ;;  %v459_v40 = vadd.f32 %v458_v38, %v457_v36 }
  0xfa   : > { %v461_v44 = vadd.f32 %v460_v41, %v459_v40  ;;  %v433_v45 = vadd.f32 %v432_v42, %v431_v39 }
  0xfc   : > { %v435_v49 = vadd.f32 %v434_v47, %v433_v45  ;;  %v463_v50 = vadd.f32 %v462_v46, %v461_v44 }
  0xfe   : > { %v437_v54 = vadd.f32 %v436_v53, %v435_v49  ;;  %v465_v55 = vadd.f32 %v464_v52, %v463_v50 }
 0x100   : > { %v439_v59 = vadd.f32 %v438_v56, %v437_v54  ;;  %v467_v60 = vadd.f32 %v466_v58, %v465_v55 }
 0x102   : > { %v441_v63 = vadd.f32 %v440_v62, %v439_v59  ;;  %v469_v0 = vadd.f32 %v468_v61, %v467_v60 }
 0x104   : > { %v442_v2 = vrot.slane %v441_v63, 4  ;;  %v471_v3 = vadd.f32 %v470_v1, %v469_v0 }
 0x106   : > { %v443_v4 = vadd.f32 %v442_v2, %v441_v63  ;;  %v472_v5 = vrot.slane %v471_v3, 4 }
 0x108   : > { %v444_v6 = vrot.slane %v443_v4, 2  ;;  %v473_v7 = vadd.f32 %v472_v5, %v471_v3 }
 0x10a   : > { %v445_v8 = vadd.f32 %v444_v6, %v443_v4  ;;  %v474_v9 = vrot.slane %v473_v7, 2 }
 0x10c   : > { %v446_v10 = vrot.slane %v445_v8, 1  ;;  %v475_v11 = vadd.f32 %v474_v9, %v473_v7 }
 0x10e   : > { %v447_v12 = vadd.f32 %v446_v10, %v445_v8  ;;  %v476_v13 = vrot.slane %v475_v11, 1 }
 0x110   : > { %448 = vst.msk [vmem:[%s244_s27] sm:$0xff] %vm418_vm0, %v447_v12  ;;  %v477_v14 = vadd.f32 %v476_v13, %v475_v11 }
 0x112   : > { %478 = vst.msk [vmem:[%s248_s30] sm:$0xff] %vm418_vm0, %v477_v14 }
 0x113 PF: > { %s16_s18 = sadd.s32 1, %s701_s18  }
 0x114   : > { %p13_p5 = scmp.ge.s32.totalorder %s16_s18, 6  }
 0x116   :  { %15 = sbr.rel (!%p13_p5) target bundleno = 1 (0x1), region = 86 }

// kernel: tile.43
= control target key start
LH: loop header
LB: loop body
LE: loop exit
PB: predicated region body
PF: predicated region fallthrough
CT: control target
= control target key end

     0   :  { %s22_s0 = inlined_call_operand.vmem [shape: f32[32], index: 0, kind: input, shape index: {}]   ;;  %s23_s1 = inlined_call_operand.vmem [shape: f32[8,32], index: 1, kind: output, shape index: {}]  }
   0x1   :  { %v4_v0 = vld [vmem:[%s22_s0] ss:$0 sm:$0xff] }
   0x2   :  { %5 = vst [vmem:[%s23_s1] sm:$0xff] %v4_v0 }

// kernel: tile.44
= control target key start
LH: loop header
LB: loop body
LE: loop exit
PB: predicated region body
PF: predicated region fallthrough
CT: control target
= control target key end

     0   :  { %s7_s6 = smov 3  ;;  %s14_s9 = smov 3  ;;  %vm4_vm0 = vcmask 261120   ;;  %vm11_vm1 = vcmask 1048320   ;;  %vm18_vm2 = vcmask 785920   ;;  %vm25_vm3 = vcmask 523520   ;;  %s79_s0 = inlined_call_operand.vmem [shape: f32[8,32], index: 0, kind: input, shape index: {}]   ;;  %s80_s1 = inlined_call_operand.vmem [shape: f32[1,256], index: 1, kind: output, shape index: {}]  }
   0x1   :  { %v41_v0 = vld [vmem:[%s79_s0 + $0x3] ss:$4 sm:%s7_s6]   ;;  %s48_s10 = smov 96   ;;  %s21_s11 = smov 3  ;;  %v42_v1 = vld [vmem:[%s79_s0 + $0x2] ss:$4 sm:%s14_s9]  }
   0x2   :  { %9 = vrot.lane.b32.xlu0 %v41_v0, %s48_s10  ;;  %v43_v2 = vld [vmem:[%s79_s0 + $0x1] ss:$4 sm:%s21_s11]   ;;  %s2_s16 = smov 3  ;;  %s49_s17 = smov 32  }
   0x3   :  { %23 = vrot.lane.b32.xlu1 %v43_v2, %s49_s17  ;;  %v3_v3 = vld [vmem:[%s79_s0] ss:$4 sm:%s2_s16]   ;;  %s50_s0 = smov 64  }
   0x4   :  { %5 = vst.msk [vmem:[#allocation0] ss:$8 sm:$0x3] %vm4_vm0, %v3_v3  }
   0x6   :  { %16 = vrot.lane.b32.xlu0 %v42_v1, %s50_s0 }
  0x74   :  { %v10_v4 = vpop.permute.xlu0 %9  }
  0x75   :  { %12 = vst.msk [vmem:[#allocation0] ss:$8 sm:$0x3] %vm11_vm1, %v10_v4   ;;  %v24_v5 = vpop.permute.xlu1 %23  }
  0x78   :  { %v17_v6 = vpop.permute.xlu0 %16  }
  0x79   :  { %19 = vst.msk [vmem:[#allocation0] ss:$8 sm:$0x3] %vm18_vm2, %v17_v6  }
  0x7a   :  { %26 = vst.msk [vmem:[#allocation0] ss:$8 sm:$0x3] %vm25_vm3, %v24_v5  }
  0x81   :  { %v31_v7 = vld [vmem:[#allocation0] sm:$0x1]  ;;  %v36_v8 = vld [vmem:[#allocation0 + $0x8] sm:$0x1] }
  0x82   :  { %34 = vst [vmem:[%s80_s1] sm:$0x1] %v31_v7  ;;  %44 = vst [vmem:[%s80_s1 + $0x1] sm:$0x1] %v36_v8 }

// kernel: encoder_forward.10
= control target key start
LH: loop header
LB: loop body
LE: loop exit
PB: predicated region body
PF: predicated region fallthrough
CT: control target
= control target key end

     0   :  { %v18_v0 = vlaneseq  ;;  %s98_s1 = inlined_call_operand.vmem [shape: f32[1,256], index: 1, kind: input, shape index: {}]   ;;  %s99_s2 = inlined_call_operand.vmem [shape: f32[1,256], index: 2, kind: input, shape index: {}]   ;;  %s100_s0 = inlined_call_operand.vmem [shape: f32[8,256], index: 0, kind: input, shape index: {}]   ;;  %s101_s3 = inlined_call_operand.vmem [shape: bf16[8,256], index: 3, kind: output, shape index: {}]  }
   0x1   :  { %v16_v2 = vld [vmem:[%s98_s1] sm:$0x3]  ;;  %v15_v7 = vld [vmem:[%s100_s0 + $0x8] sm:$0xff] }
   0x2   :  { %v19_v1 = vshrl.u32 %v18_v0, 7  ;;  %v30_v3 = vld [vmem:[%s99_s2] sm:$0x3] }
   0x3   :  { %v14_v6 = vld [vmem:[%s100_s0] sm:$0xff] }
   0x4   :  { %v20_v4 = vsub.s32 0, %v19_v1  ;;  %v24_v5 = vsub.s32 1, %v19_v1 }
   0x6   :  { %v21_v8 = vrot.slane %v16_v2, %v20_v4  ;;  %v25_v9 = vrot.slane %v16_v2, %v24_v5  ;;  %v35_v10 = vrot.slane %v30_v3, %v20_v4  ;;  %v39_v11 = vrot.slane %v30_v3, %v24_v5 }
   0x8   :  { %v28_v12 = vmul.f32 %v21_v8, %v14_v6  ;;  %v29_v13 = vmul.f32 %v25_v9, %v15_v7 }
   0xa   :  { %v42_v14 = vadd.f32 %v35_v10, %v28_v12  ;;  %v43_v15 = vadd.f32 %v39_v11, %v29_v13 }
   0xc   :  { %v44_v16 = vmul.f32 0.01, %v42_v14  ;;  %v45_v17 = vmul.f32 0.01, %v43_v15 }
   0xe   :  { %v46_v18 = vmax.f32 %v42_v14, %v44_v16  ;;  %v47_v19 = vmax.f32 %v43_v15, %v45_v17 }
  0x10   :  { %v62_v20 = vpack.c.bf16 %v47_v19, %v46_v18 }
  0x12   :  { %56 = vst [vmem:[%s101_s3] sm:$0xff] %v62_v20 }

// kernel: encoder_forward.9
= control target key start
LH: loop header
LB: loop body
LE: loop exit
PB: predicated region body
PF: predicated region fallthrough
CT: control target
= control target key end

     0   :  { %vm266_vm0 = vcmask 261120   ;;  %s609_s1 = inlined_call_operand.vmem [shape: bf16[256,32], index: 1, kind: input, shape index: {}]   ;;  %s610_s0 = inlined_call_operand.vmem [shape: bf16[64,256], index: 0, kind: input, shape index: {}]   ;;  %s611_s2 = inlined_call_operand.vmem [shape: f32[1,32], index: 2, kind: input, shape index: {}]   ;;  %s612_s3 = inlined_call_operand.vmem [shape: f32[64,32], index: 3, kind: output, shape index: {0}]   ;;  %s613_s4 = inlined_call_operand.vmem [shape: f32[1,8,32], index: 4, kind: output, shape index: {1}]   ;;  %s614_s5 = inlined_call_operand.vmem [shape: f32[1,8,32], index: 5, kind: output, shape index: {2}]  }
   0x1   :  { %v420_v0 = vld [vmem:[%s609_s1 + $0x78] sm:$0xff]   ;;  %v422_v2 = vld [vmem:[%s609_s1 + $0x70] sm:$0xff]   ;;  %v424_v4 = vld [vmem:[%s609_s1 + $0x68] sm:$0xff]  }
   0x2   :  { %v421_v1 = vld [vmem:[%s609_s1 + $0x38] sm:$0xff]   ;;  %364 = vmatprep.subr.bf16.mxu0 %v420_v0  ;;  %404 = vmatprep.subr.bf16.mxu1 %v420_v0  ;;  %v423_v3 = vld [vmem:[%s609_s1 + $0x30] sm:$0xff]   ;;  %v425_v5 = vld [vmem:[%s609_s1 + $0x28] sm:$0xff]  }
   0x3   :  { %365 = vmatpush3.bf16.msra.mxu0 %v421_v1  ;;  %412 = vmatpush3.bf16.msra.mxu1 %v421_v1  ;;  %v426_v6 = vld [vmem:[%s609_s1 + $0x60] sm:$0xff]   ;;  %v428_v8 = vld [vmem:[%s609_s1 + $0x58] sm:$0xff]   ;;  %v430_v10 = vld [vmem:[%s609_s1 + $0x50] sm:$0xff]  }
   0x4   :  { %366 = vmatprep.subr.bf16.mxu0 %v422_v2  ;;  %405 = vmatprep.subr.bf16.mxu1 %v422_v2  ;;  %v427_v7 = vld [vmem:[%s609_s1 + $0x20] sm:$0xff]   ;;  %v429_v9 = vld [vmem:[%s609_s1 + $0x18] sm:$0xff]   ;;  %v431_v13 = vld [vmem:[%s609_s1 + $0x10] sm:$0xff]  }
   0x5   :  { %v438_v11 = vld [vmem:[%s610_s0 + $0x4] ss:$8 sps:$4 sm:$0xff]   ;;  %v436_v18 = vld [vmem:[%s610_s0] ss:$8 sps:$4 sm:$0xff]   ;;  %v442_v20 = vld [vmem:[%s610_s0 + $0x14] ss:$8 sps:$4 sm:$0xff]  }
   0x6   :  { %v441_v12 = vld [vmem:[%s610_s0 + $0x24] ss:$8 sps:$4 sm:$0xff]   ;;  %233 = vmatprep.mubr.bf16.mxu0 %v438_v11  ;;  %v439_v19 = vld [vmem:[%s610_s0 + $0x20] ss:$8 sps:$4 sm:$0xff]   ;;  %v445_v21 = vld [vmem:[%s610_s0 + $0x34] ss:$8 sps:$4 sm:$0xff]  }
   0x7   :  { %367 = vmatpush3.bf16.msra.mxu0 %v423_v3  ;;  %413 = vmatpush3.bf16.msra.mxu1 %v423_v3  ;;  %v432_v14 = vld [vmem:[%s609_s1 + $0x48] sm:$0xff]   ;;  %v434_v16 = vld [vmem:[%s609_s1 + $0x40] sm:$0xff]   ;;  %v444_v22 = vld [vmem:[%s610_s0 + $0x10] ss:$8 sps:$4 sm:$0xff]  }
   0x8   :  { %368 = vmatprep.subr.bf16.mxu0 %v424_v4  ;;  %406 = vmatprep.subr.bf16.mxu1 %v424_v4  ;;  %v433_v15 = vld [vmem:[%s609_s1 + $0x8] sm:$0xff]   ;;  %v435_v17 = vld [vmem:[%s609_s1] sm:$0xff]   ;;  %v447_v23 = vld [vmem:[%s610_s0 + $0x30] ss:$8 sps:$4 sm:$0xff]  }
   0x9   :  { %249 = vmatprep.mubr.bf16.mxu1 %v441_v12  ;;  %v339_v26 = vld [vmem:[%s611_s2] ss:$0 sm:$0xff] }
   0xb   :  { %369 = vmatpush3.bf16.msra.mxu0 %v425_v5  ;;  %414 = vmatpush3.bf16.msra.mxu1 %v425_v5 }
   0xc   :  { %370 = vmatprep.subr.bf16.mxu0 %v426_v6  ;;  %407 = vmatprep.subr.bf16.mxu1 %v426_v6 }
   0xf   :  { %371 = vmatpush3.bf16.msra.mxu0 %v427_v7  ;;  %415 = vmatpush3.bf16.msra.mxu1 %v427_v7 }
  0x10   :  { %372 = vmatprep.subr.bf16.mxu0 %v428_v8  ;;  %408 = vmatprep.subr.bf16.mxu1 %v428_v8 }
  0x13   :  { %373 = vmatpush3.bf16.msra.mxu0 %v429_v9  ;;  %416 = vmatpush3.bf16.msra.mxu1 %v429_v9 }
  0x14   :  { %374 = vmatprep.subr.bf16.mxu0 %v430_v10  ;;  %409 = vmatprep.subr.bf16.mxu1 %v430_v10 }
  0x17   :  { %375 = vmatpush3.bf16.msra.mxu0 %v431_v13  ;;  %417 = vmatpush3.bf16.msra.mxu1 %v431_v13 }
  0x18   :  { %376 = vmatprep.subr.bf16.mxu0 %v432_v14  ;;  %410 = vmatprep.subr.bf16.mxu1 %v432_v14 }
  0x1b   :  { %377 = vmatpush3.bf16.msra.mxu0 %v433_v15  ;;  %418 = vmatpush3.bf16.msra.mxu1 %v433_v15 }
  0x1c   :  { %378 = vmatprep.subr.bf16.mxu0 %v434_v16  ;;  %411 = vmatprep.subr.bf16.mxu1 %v434_v16 }
  0x1f   :  { %379 = vmatpush3.bf16.msra.mxu0 %v435_v17  ;;  %419 = vmatpush3.bf16.msra.mxu1 %v435_v17 }
  0x22   :  { %234 = vmatmul.mubr.bf16.vlgmr.msra.gmra.mxu0 %v436_v18  ;;  %250 = vmatmul.mubr.bf16.vlgmr.msra.gmra.mxu1 %v439_v19 }
  0x23   :  { %241 = vmatprep.mubr.bf16.mxu0 %v442_v20  ;;  %257 = vmatprep.mubr.bf16.mxu1 %v445_v21 }
  0x2a   :  { %242 = vmatmul.mubr.bf16.gmra.mxu0 %v444_v22  ;;  %258 = vmatmul.mubr.bf16.gmra.mxu1 %v447_v23 }
  0xe2   :  { %v380_v24 = vpop.f32.mrf.mxu0  ;;  %v392_v25 = vpop.f32.mrf.mxu1 }
  0xe4   :  { %v381_v27 = vpop.f32.mrf.mxu0  ;;  %v393_v28 = vpop.f32.mrf.mxu1 }
  0xe5   :  { %v382_v29 = vadd.f32 %v381_v27, %v380_v24  ;;  %v394_v30 = vadd.f32 %v393_v28, %v392_v25 }
  0xe6   :  { %v383_v31 = vpop.f32.mrf.mxu0  ;;  %v395_v32 = vpop.f32.mrf.mxu1 }
  0xe7   :  { %v236_v33 = vadd.f32 %v382_v29, %v339_v26  ;;  %v252_v34 = vadd.f32 %v394_v30, %v339_v26 }
  0xe8   :  { %v384_v35 = vpop.f32.mrf.mxu0  ;;  %v396_v36 = vpop.f32.mrf.mxu1 }
  0xe9   :  { %267 = vst.msk [vmem:[%s612_s3] sm:$0xff] %vm266_vm0, %v236_v33  ;;  %271 = vst.msk [vmem:[%s612_s3 + $0x20] sm:$0xff] %vm266_vm0, %v252_v34  ;;  %v385_v37 = vadd.f32 %v384_v35, %v383_v31  ;;  %v397_v39 = vadd.f32 %v396_v36, %v395_v32  ;;  %v297_v52 = vmul.f32 %v236_v33, %v236_v33  ;;  %v275_v56 = vsel %vm266_vm0, %v236_v33, 0.0 }
  0xea   :  { %v386_v38 = vpop.f32.mrf.mxu0  ;;  %v398_v40 = vpop.f32.mrf.mxu1  ;;  %v301_v5 = vmul.f32 %v252_v34, %v252_v34  ;;  %v282_v10 = vsel %vm266_vm0, %v252_v34, 0.0 }
  0xeb   :  { %v239_v41 = vadd.f32 %v385_v37, %v339_v26  ;;  %v255_v42 = vadd.f32 %v397_v39, %v339_v26  ;;  %v305_v63 = vsel %vm266_vm0, %v297_v52, 0.0 }
  0xec   :  { %v387_v43 = vpop.f32.mrf.mxu0  ;;  %v399_v44 = vpop.f32.mrf.mxu1  ;;  %v312_v15 = vsel %vm266_vm0, %v301_v5, 0.0 }
  0xed   :  { %v388_v45 = vadd.f32 %v387_v43, %v386_v38  ;;  %v400_v46 = vadd.f32 %v399_v44, %v398_v40  ;;  %268 = vst.msk [vmem:[%s612_s3 + $0x8] sm:$0xff] %vm266_vm0, %v239_v41  ;;  %v298_v47 = vmul.f32 %v239_v41, %v239_v41  ;;  %272 = vst.msk [vmem:[%s612_s3 + $0x28] sm:$0xff] %vm266_vm0, %v255_v42  ;;  %v276_v53 = vsel %vm266_vm0, %v239_v41, 0.0 }
  0xee   :  { %v389_v48 = vpop.f32.mrf.mxu0  ;;  %v401_v49 = vpop.f32.mrf.mxu1  ;;  %v277_v62 = vadd.f32 %v276_v53, %v275_v56  ;;  %v302_v11 = vmul.f32 %v255_v42, %v255_v42  ;;  %v284_v16 = vsel %vm266_vm0, %v255_v42, 0.0 }
  0xef   :  { %v244_v50 = vadd.f32 %v388_v45, %v339_v26  ;;  %v260_v51 = vadd.f32 %v400_v46, %v339_v26  ;;  %v306_v58 = vsel %vm266_vm0, %v298_v47, 0.0 }
  0xf0   :  { %v390_v54 = vpop.f32.mrf.mxu0  ;;  %v402_v55 = vpop.f32.mrf.mxu1  ;;  %v307_v3 = vadd.f32 %v306_v58, %v305_v63  ;;  %v314_v20 = vsel %vm266_vm0, %v302_v11, 0.0 }
  0xf1   :  { %269 = vst.msk [vmem:[%s612_s3 + $0x10] sm:$0xff] %vm266_vm0, %v244_v50  ;;  %v299_v57 = vmul.f32 %v244_v50, %v244_v50  ;;  %273 = vst.msk [vmem:[%s612_s3 + $0x30] sm:$0xff] %vm266_vm0, %v260_v51  ;;  %v278_v59 = vsel %vm266_vm0, %v244_v50, 0.0  ;;  %v391_v60 = vadd.f32 %v390_v54, %v389_v48  ;;  %v403_v61 = vadd.f32 %v402_v55, %v401_v49 }
  0xf2   :  { %v279_v4 = vadd.f32 %v278_v59, %v277_v62  ;;  %v303_v17 = vmul.f32 %v260_v51, %v260_v51  ;;  %v286_v21 = vsel %vm266_vm0, %v260_v51, 0.0 }
  0xf3   :  { %v308_v0 = vsel %vm266_vm0, %v299_v57, 0.0  ;;  %v247_v1 = vadd.f32 %v391_v60, %v339_v26  ;;  %v263_v2 = vadd.f32 %v403_v61, %v339_v26 }
  0xf4   :  { %v309_v8 = vadd.f32 %v308_v0, %v307_v3  ;;  %v316_v25 = vsel %vm266_vm0, %v303_v17, 0.0 }
  0xf5   :  { %270 = vst.msk [vmem:[%s612_s3 + $0x18] sm:$0xff] %vm266_vm0, %v247_v1  ;;  %v280_v6 = vsel %vm266_vm0, %v247_v1, 0.0  ;;  %v300_v7 = vmul.f32 %v247_v1, %v247_v1  ;;  %274 = vst.msk [vmem:[%s612_s3 + $0x38] sm:$0xff] %vm266_vm0, %v263_v2  ;;  %v304_v22 = vmul.f32 %v263_v2, %v263_v2  ;;  %v288_v26 = vsel %vm266_vm0, %v263_v2, 0.0 }
  0xf6   :  { %v281_v9 = vadd.f32 %v280_v6, %v279_v4 }
  0xf7   :  { %v310_v12 = vsel %vm266_vm0, %v300_v7, 0.0  ;;  %v318_v29 = vsel %vm266_vm0, %v304_v22, 0.0 }
  0xf8   :  { %v283_v13 = vadd.f32 %v282_v10, %v281_v9  ;;  %v311_v14 = vadd.f32 %v310_v12, %v309_v8 }
  0xfa   :  { %v313_v18 = vadd.f32 %v312_v15, %v311_v14  ;;  %v285_v19 = vadd.f32 %v284_v16, %v283_v13 }
  0xfc   :  { %v287_v23 = vadd.f32 %v286_v21, %v285_v19  ;;  %v315_v24 = vadd.f32 %v314_v20, %v313_v18 }
  0xfe   :  { %v289_v27 = vadd.f32 %v288_v26, %v287_v23  ;;  %v317_v28 = vadd.f32 %v316_v25, %v315_v24 }
 0x100   :  { %v290_v30 = vrot.slane %v289_v27, 4  ;;  %v319_v31 = vadd.f32 %v318_v29, %v317_v28 }
 0x102   :  { %v291_v32 = vadd.f32 %v290_v30, %v289_v27  ;;  %v320_v33 = vrot.slane %v319_v31, 4 }
 0x104   :  { %v292_v34 = vrot.slane %v291_v32, 2  ;;  %v321_v35 = vadd.f32 %v320_v33, %v319_v31 }
 0x106   :  { %v293_v36 = vadd.f32 %v292_v34, %v291_v32  ;;  %v322_v37 = vrot.slane %v321_v35, 2 }
 0x108   :  { %v294_v38 = vrot.slane %v293_v36, 1  ;;  %v323_v39 = vadd.f32 %v322_v37, %v321_v35 }
 0x10a   :  { %v295_v40 = vadd.f32 %v294_v38, %v293_v36  ;;  %v324_v41 = vrot.slane %v323_v39, 1 }
 0x10c   :  { %296 = vst.msk [vmem:[%s613_s4] sm:$0xff] %vm266_vm0, %v295_v40  ;;  %v325_v42 = vadd.f32 %v324_v41, %v323_v39 }
 0x10e   :  { %326 = vst.msk [vmem:[%s614_s5] sm:$0xff] %vm266_vm0, %v325_v42 }

// kernel: tile.53
= control target key start
LH: loop header
LB: loop body
LE: loop exit
PB: predicated region body
PF: predicated region fallthrough
CT: control target
= control target key end

     0   :  { %s22_s0 = inlined_call_operand.vmem [shape: f32[64], index: 0, kind: input, shape index: {}]   ;;  %s23_s1 = inlined_call_operand.vmem [shape: f32[8,64], index: 1, kind: output, shape index: {}]  }
   0x1   :  { %v4_v0 = vld [vmem:[%s22_s0] ss:$0 sm:$0xff] }
   0x2   :  { %5 = vst [vmem:[%s23_s1] sm:$0xff] %v4_v0 }

// kernel: tile.54
= control target key start
LH: loop header
LB: loop body
LE: loop exit
PB: predicated region body
PF: predicated region fallthrough
CT: control target
= control target key end

     0   :  { %vm3_vm0 = vcmask 523264   ;;  %s46_s8 = smov 64   ;;  %vm9_vm1 = vcmask 1048064   ;;  %s75_s0 = inlined_call_operand.vmem [shape: f32[8,64], index: 0, kind: input, shape index: {}]   ;;  %s76_s1 = inlined_call_operand.vmem [shape: f32[1,512], index: 1, kind: output, shape index: {}]  }
   0x1   :  { %v41_v0 = vld [vmem:[%s75_s0 + $0x1] ss:$2 sm:$0xf]   ;;  %v2_v1 = vld [vmem:[%s75_s0] ss:$2 sm:$0xf]  }
   0x2   :  { %7 = vrot.lane.b32.xlu0 %v41_v0, %s46_s8  ;;  %4 = vst.msk [vmem:[#allocation0] ss:$8 sm:$0xf] %vm3_vm0, %v2_v1  }
  0x74   :  { %v8_v2 = vpop.permute.xlu0 %7  }
  0x75   :  { %10 = vst.msk [vmem:[#allocation0] ss:$8 sm:$0xf] %vm9_vm1, %v8_v2  }
  0x7c   :  { %v15_v3 = vld [vmem:[#allocation0] sm:$0x1]  ;;  %v20_v4 = vld [vmem:[#allocation0 + $0x8] sm:$0x1]  ;;  %v26_v5 = vld [vmem:[#allocation0 + $0x10] sm:$0x1] }
  0x7d   :  { %18 = vst [vmem:[%s76_s1] sm:$0x1] %v15_v3  ;;  %42 = vst [vmem:[%s76_s1 + $0x1] sm:$0x1] %v20_v4  ;;  %v33_v6 = vld [vmem:[#allocation0 + $0x18] sm:$0x1] }
  0x7e   :  { %43 = vst [vmem:[%s76_s1 + $0x2] sm:$0x1] %v26_v5  ;;  %44 = vst [vmem:[%s76_s1 + $0x3] sm:$0x1] %v33_v6 }

// kernel: encoder_forward.12
= control target key start
LH: loop header
LB: loop body
LE: loop exit
PB: predicated region body
PF: predicated region fallthrough
CT: control target
= control target key end

     0   :  { %v17_v0 = vlaneseq  ;;  %v156_v1 = vmov 1983009808   ;;  %v157_v33 = vmov 1966171168   ;;  %s190_s1 = inlined_call_operand.vmem [shape: f32[1,512], index: 1, kind: input, shape index: {}]   ;;  %s191_s2 = inlined_call_operand.vmem [shape: f32[1,512], index: 2, kind: input, shape index: {}]   ;;  %s192_s0 = inlined_call_operand.vmem [shape: f32[2,512], index: 0, kind: input, shape index: {}]   ;;  %s193_s3 = inlined_call_operand.vmem [shape: bf16[2,512], index: 3, kind: output, shape index: {}]  }
   0x1   :  { %v36_v2 = vunpack.c.l.s4 %v156_v1  ;;  %v15_v4 = vld [vmem:[%s190_s1] sm:$0xf]  ;;  %v124_v34 = vunpack.c.l.s4 %v157_v33 }
   0x2   :  { %v18_v3 = vshrl.u32 %v17_v0, 7  ;;  %v52_v10 = vld [vmem:[%s191_s2] sm:$0xf] }
   0x3   :  { %v37_v5 = vunpack.c.0.s8 %v36_v2  ;;  %v14_v26 = vld [vmem:[%s192_s0] sm:$0xff]  ;;  %v125_v37 = vunpack.c.0.s8 %v124_v34 }
   0x4   :  { %v19_v6 = vsub.s32 0, %v18_v3  ;;  %v23_v7 = vsub.s32 1, %v18_v3  ;;  %v27_v8 = vsub.s32 2, %v18_v3  ;;  %v31_v9 = vsub.s32 3, %v18_v3 }
   0x5   :  { %v40_v11 = vsub.s32 %v37_v5, %v18_v3  ;;  %v128_v42 = vsub.s32 %v125_v37, %v18_v3 }
   0x6   :  { %v20_v12 = vrot.slane %v15_v4, %v19_v6  ;;  %v24_v13 = vrot.slane %v15_v4, %v23_v7  ;;  %v28_v14 = vrot.slane %v15_v4, %v27_v8  ;;  %v32_v15 = vrot.slane %v15_v4, %v31_v9 }
   0x7   :  { %v57_v16 = vrot.slane %v52_v10, %v19_v6  ;;  %v61_v17 = vrot.slane %v52_v10, %v23_v7  ;;  %v65_v18 = vrot.slane %v52_v10, %v27_v8  ;;  %v69_v19 = vrot.slane %v52_v10, %v31_v9 }
   0x8   :  { %v33_v20 = vcombine.low %v20_v12, %v24_v13  ;;  %v34_v21 = vcombine.low %v28_v14, %v32_v15 }
   0x9   :  { %v70_v22 = vcombine.low %v57_v16, %v61_v17  ;;  %v71_v23 = vcombine.low %v65_v18, %v69_v19 }
   0xa   :  { %v41_v24 = vrot.slane %v33_v20, %v40_v11  ;;  %v48_v25 = vrot.slane %v34_v21, %v40_v11 }
   0xb   :  { %v78_v27 = vrot.slane %v70_v22, %v40_v11  ;;  %v85_v28 = vrot.slane %v71_v23, %v40_v11 }
   0xc   :  { %v49_v29 = vcombine.low %v41_v24, %v48_v25 }
   0xd   :  { %v86_v30 = vcombine.low %v78_v27, %v85_v28 }
   0xe   :  { %v51_v31 = vmul.f32 %v49_v29, %v14_v26 }
  0x10   :  { %v88_v32 = vadd.f32 %v86_v30, %v51_v31 }
  0x12   :  { %v89_v35 = vmul.f32 0.01, %v88_v32 }
  0x14   :  { %v90_v36 = vmax.f32 %v88_v32, %v89_v35 }
  0x16   :  { %v92_v38 = vcombine.high %v90_v36, %v90_v36  ;;  %v99_v39 = vrot.slane %v90_v36, %v40_v11 }
  0x18   :  { %v106_v40 = vrot.slane %v92_v38, %v40_v11  ;;  %v107_v41 = vcombine.high %v99_v39, %v99_v39 }
  0x1a   :  { %v108_v43 = vcombine.high %v106_v40, %v106_v40  ;;  %v151_v44 = vpack.c.bf16 %v107_v41, %v99_v39 }
  0x1c   :  { %v152_v45 = vpack.c.bf16 %v108_v43, %v106_v40  ;;  %v129_v46 = vrot.slane %v151_v44, %v128_v42 }
  0x1e   :  { %v136_v47 = vrot.slane %v152_v45, %v128_v42 }
  0x20   :  { %v137_v48 = vcombine.low %v129_v46, %v136_v47 }
  0x22   :  { %153 = vst.sshfl [vmem:[%s193_s3] sm:$0x55 pattern:$0x73625140] %v137_v48 }

// kernel: encoder_forward.11
= control target key start
LH: loop header
LB: loop body
LE: loop exit
PB: predicated region body
PF: predicated region fallthrough
CT: control target
= control target key end

     0   :  { %v465_v1 = vmov 0.0   ;;  %vm466_vm0 = vmmov 0   ;;  %vm319_vm1 = vcmask 523264   ;;  %s601_s1 = inlined_call_operand.vmem [shape: bf16[384,64], index: 1, kind: input, shape index: {}]   ;;  %s602_s0 = inlined_call_operand.vmem [shape: bf16[16,384], index: 0, kind: input, shape index: {}]   ;;  %s603_s2 = inlined_call_operand.vmem [shape: f32[1,64], index: 2, kind: input, shape index: {}]   ;;  %s604_s3 = inlined_call_operand.vmem [shape: f32[16,64], index: 3, kind: output, shape index: {0}]   ;;  %s605_s4 = inlined_call_operand.vmem [shape: f32[1,8,64], index: 4, kind: output, shape index: {1}]   ;;  %s606_s5 = inlined_call_operand.vmem [shape: f32[1,8,64], index: 5, kind: output, shape index: {2}]  }
   0x1   :  { %v437_v0 = vld [vmem:[%s601_s1 + $0x78] sm:$0xff]   ;;  %415 = vmatprep.subr.bf16.mxu1 %v465_v1  ;;  %431 = vmatprep.mubr.msk.bf16.mxu1 %vm466_vm0, %v465_v1  ;;  %v440_v4 = vld [vmem:[%s601_s1 + $0x70] sm:$0xff]   ;;  %v443_v7 = vld [vmem:[%s601_s1 + $0x68] sm:$0xff]  }
   0x2   :  { %v438_v2 = vld [vmem:[%s601_s1 + $0x38] sm:$0xff]   ;;  %384 = vmatprep.subr.bf16.mxu0 %v437_v0  ;;  %v441_v5 = vld [vmem:[%s601_s1 + $0x30] sm:$0xff]   ;;  %v444_v8 = vld [vmem:[%s601_s1 + $0x28] sm:$0xff]  }
   0x3   :  { %v439_v3 = vld [vmem:[%s601_s1 + $0xb8] sm:$0xff]   ;;  %385 = vmatpush3.bf16.msra.mxu0 %v438_v2  ;;  %v442_v6 = vld [vmem:[%s601_s1 + $0xb0] sm:$0xff]   ;;  %v445_v9 = vld [vmem:[%s601_s1 + $0xa8] sm:$0xff]  }
   0x4   :  { %416 = vmatpush3.bf16.msra.mxu1 %v439_v3  ;;  %386 = vmatprep.subr.bf16.mxu0 %v440_v4  ;;  %v446_v10 = vld [vmem:[%s601_s1 + $0x60] sm:$0xff]   ;;  %v449_v13 = vld [vmem:[%s601_s1 + $0x58] sm:$0xff]   ;;  %v452_v16 = vld [vmem:[%s601_s1 + $0x50] sm:$0xff]  }
   0x5   :  { %417 = vmatprep.subr.bf16.mxu1 %v465_v1  ;;  %v447_v11 = vld [vmem:[%s601_s1 + $0x20] sm:$0xff]   ;;  %v450_v14 = vld [vmem:[%s601_s1 + $0x18] sm:$0xff]   ;;  %v453_v17 = vld [vmem:[%s601_s1 + $0x10] sm:$0xff]  }
   0x6   :  { %v448_v12 = vld [vmem:[%s601_s1 + $0xa0] sm:$0xff]   ;;  %v451_v15 = vld [vmem:[%s601_s1 + $0x98] sm:$0xff]   ;;  %v454_v18 = vld [vmem:[%s601_s1 + $0x90] sm:$0xff]  }
   0x7   :  { %387 = vmatpush3.bf16.msra.mxu0 %v441_v5  ;;  %v455_v19 = vld [vmem:[%s601_s1 + $0x48] sm:$0xff]   ;;  %v458_v22 = vld [vmem:[%s601_s1 + $0x40] sm:$0xff]  }
   0x8   :  { %418 = vmatpush3.bf16.msra.mxu1 %v442_v6  ;;  %388 = vmatprep.subr.bf16.mxu0 %v443_v7  ;;  %v456_v20 = vld [vmem:[%s601_s1 + $0x8] sm:$0xff]   ;;  %v463_v23 = vld [vmem:[%s602_s0 + $0x4] ss:$12 sps:$4 sm:$0xff]   ;;  %v356_v30 = vld [vmem:[%s603_s2] ss:$0 sm:$0xff] }
   0x9   :  { %419 = vmatprep.subr.bf16.mxu1 %v465_v1  ;;  %v457_v21 = vld [vmem:[%s601_s1 + $0x88] sm:$0xff]   ;;  %v459_v24 = vld [vmem:[%s601_s1] sm:$0xff]   ;;  %269 = vmatprep.mubr.bf16.mxu0 %v463_v23 }
   0xa   :  { %v460_v25 = vld [vmem:[%s601_s1 + $0x80] sm:$0xff]   ;;  %v464_v27 = vld [vmem:[%s602_s0 + $0x8] ss:$12 sps:$4 sm:$0xff]  }
   0xb   :  { %389 = vmatpush3.bf16.msra.mxu0 %v444_v8  ;;  %v461_v26 = vld [vmem:[%s602_s0] ss:$12 sps:$4 sm:$0xff]  }
   0xc   :  { %420 = vmatpush3.bf16.msra.mxu1 %v445_v9  ;;  %390 = vmatprep.subr.bf16.mxu0 %v446_v10 }
   0xd   :  { %421 = vmatprep.subr.bf16.mxu1 %v465_v1 }
   0xf   :  { %391 = vmatpush3.bf16.msra.mxu0 %v447_v11 }
  0x10   :  { %422 = vmatpush3.bf16.msra.mxu1 %v448_v12  ;;  %392 = vmatprep.subr.bf16.mxu0 %v449_v13 }
  0x11   :  { %423 = vmatprep.subr.bf16.mxu1 %v465_v1 }
  0x13   :  { %393 = vmatpush3.bf16.msra.mxu0 %v450_v14 }
  0x14   :  { %424 = vmatpush3.bf16.msra.mxu1 %v451_v15  ;;  %394 = vmatprep.subr.bf16.mxu0 %v452_v16 }
  0x15   :  { %425 = vmatprep.subr.bf16.mxu1 %v465_v1 }
  0x17   :  { %395 = vmatpush3.bf16.msra.mxu0 %v453_v17 }
  0x18   :  { %426 = vmatpush3.bf16.msra.mxu1 %v454_v18  ;;  %396 = vmatprep.subr.bf16.mxu0 %v455_v19 }
  0x19   :  { %427 = vmatprep.subr.bf16.mxu1 %v465_v1 }
  0x1b   :  { %397 = vmatpush3.bf16.msra.mxu0 %v456_v20 }
  0x1c   :  { %428 = vmatpush3.bf16.msra.mxu1 %v457_v21  ;;  %398 = vmatprep.subr.bf16.mxu0 %v458_v22 }
  0x1d   :  { %429 = vmatprep.subr.bf16.mxu1 %v465_v1 }
  0x1f   :  { %399 = vmatpush3.bf16.msra.mxu0 %v459_v24 }
  0x20   :  { %430 = vmatpush3.bf16.msra.mxu1 %v460_v25 }
  0x22   :  { %270 = vmatmul.mubr.bf16.vlgmr.msra.gmra.mxu0 %v461_v26 }
  0x23   :  { %432 = vmatmul.mubr.bf16.vlgmr.msra.gmra.mxu1 %v464_v27 }
  0xe2   :  { %v400_v28 = vpop.f32.mrf.mxu0 }
  0xe3   :  { %v312_v29 = vpop.f32.mrf.mxu1 }
  0xe4   :  { %v401_v31 = vpop.f32.mrf.mxu0 }
  0xe5   :  { %v402_v32 = vadd.f32 %v401_v31, %v400_v28  ;;  %v433_v33 = vpop.f32.mrf.mxu1 }
  0xe6   :  { %v403_v34 = vpop.f32.mrf.mxu0 }
  0xe7   :  { %v272_v35 = vadd.f32 %v402_v32, %v356_v30  ;;  %v315_v36 = vpop.f32.mrf.mxu1 }
  0xe8   :  { %v404_v37 = vpop.f32.mrf.mxu0 }
  0xe9   :  { %v313_v38 = vadd.f32 %v312_v29, %v272_v35  ;;  %v405_v39 = vadd.f32 %v404_v37, %v403_v34  ;;  %v434_v40 = vpop.f32.mrf.mxu1 }
  0xeb   :  { %320 = vst.msk [vmem:[%s604_s3] sm:$0xff] %vm319_vm1, %v313_v38  ;;  %v275_v41 = vadd.f32 %v405_v39, %v356_v30  ;;  %v332_v42 = vmul.f32 %v313_v38, %v313_v38  ;;  %v322_v44 = vsel %vm319_vm1, %v313_v38, 0.0 }
  0xed   :  { %v316_v43 = vadd.f32 %v315_v36, %v275_v41  ;;  %v334_v48 = vsel %vm319_vm1, %v332_v42, 0.0 }
  0xef   :  { %321 = vst.msk [vmem:[%s604_s3 + $0x8] sm:$0xff] %vm319_vm1, %v316_v43  ;;  %v323_v45 = vsel %vm319_vm1, %v316_v43, 0.0  ;;  %v333_v46 = vmul.f32 %v316_v43, %v316_v43 }
  0xf0   :  { %v324_v47 = vadd.f32 %v323_v45, %v322_v44 }
  0xf1   :  { %v335_v49 = vsel %vm319_vm1, %v333_v46, 0.0 }
  0xf2   :  { %v325_v50 = vrot.slane %v324_v47, 4  ;;  %v336_v51 = vadd.f32 %v335_v49, %v334_v48 }
  0xf4   :  { %v326_v52 = vadd.f32 %v325_v50, %v324_v47  ;;  %v337_v53 = vrot.slane %v336_v51, 4 }
  0xf6   :  { %v327_v54 = vrot.slane %v326_v52, 2  ;;  %v338_v55 = vadd.f32 %v337_v53, %v336_v51 }
  0xf8   :  { %v328_v56 = vadd.f32 %v327_v54, %v326_v52  ;;  %v339_v57 = vrot.slane %v338_v55, 2 }
  0xfa   :  { %v329_v58 = vrot.slane %v328_v56, 1  ;;  %v340_v59 = vadd.f32 %v339_v57, %v338_v55 }
  0xfc   :  { %v330_v60 = vadd.f32 %v329_v58, %v328_v56  ;;  %v341_v61 = vrot.slane %v340_v59, 1 }
  0xfe   :  { %331 = vst.msk [vmem:[%s605_s4] sm:$0xff] %vm319_vm1, %v330_v60  ;;  %v342_v62 = vadd.f32 %v341_v61, %v340_v59 }
 0x100   :  { %343 = vst.msk [vmem:[%s606_s5] sm:$0xff] %vm319_vm1, %v342_v62 }

// kernel: encoder_forward.13
= control target key start
LH: loop header
LB: loop body
LE: loop exit
PB: predicated region body
PF: predicated region fallthrough
CT: control target
= control target key end

     0   :  { %12 = vsyncpa [#allocation4], 0  ;;  %s811_s0 = inlined_call_operand.vmem [shape: bf16[4,256], index: 0, kind: input, shape index: {}]   ;;  %s812_s1 = inlined_call_operand.vmem [shape: bf16[256,16], index: 1, kind: input, shape index: {}]   ;;  %s813_s2 = inlined_call_operand.vmem [shape: f32[1,16], index: 2, kind: input, shape index: {}]   ;;  %s814_s3 = inlined_call_operand.vmem [shape: f32[4,8], index: 3, kind: input, shape index: {}]   ;;  %s815_s4 = inlined_call_operand.hbm [shape: f32[4,8], index: 4, kind: output, shape index: {0}]   ;;  %s816_s5 = inlined_call_operand.hbm [shape: f32[4,8], index: 5, kind: output, shape index: {1}]   ;;  %s817_s6 = inlined_call_operand.hbm [shape: f32[4,8], index: 6, kind: output, shape index: {2}]  }
   0x1   :  { %13 = vsyncpa [#allocation6], 0  ;;  %s735_s21 = smov 0  }
   0x2 LB: > { %s741_s22 = sadd.s32 4294967295, %s690_s21   ;;  %p508_p0 = scmp.ge.s32.totalorder %s690_s21, 1  ;;  %s690_s21 = sphi %s735_s21, %s19_s21  }
   0x3   : > { %p214_p1 = scmp.lt.s32.totalorder %s690_s21, 3 }
   0x5   : > { %p215_p2 = pnand %p508_p0, %p214_p1 }
   0x6   : > { %p243_p3 = scmp.lt.s32.totalorder (!%p215_p2), %s741_s22, 1  ;;  %s510_s23 = sshll.u32 (!%p215_p2), %s741_s22, 4 }
   0x7   : > { %218 = sbr.rel (%p215_p2) target bundleno = 529 (0x211), region = 36  ;;  %p248_p4 = scmp.lt.s32.totalorder (!%p215_p2), %s510_s23, 31 }
   0x8   : > { %p512_p5 = scmp.ne.s32.totalorder (!%p215_p2), %s741_s22, 0 }
   0xc   : > { %s244_s24 = scalar_select %p243_p3, %s741_s22, 1 }
   0xd   : > { %s819_s23 = smov (!%p248_p4, %s510_s23), 31  ;;  %257 = sbr.rel (%p512_p5) target bundleno = 20 (0x14), region = 40 }
   0xe   : > { %s509_s25 = sshll.u32 %s244_s24, 1  ;;  %s511_s29 = sshll.u32 %s819_s23, 2 }
   0xf   : > { %s751_s28 = scalar_lea.vmem %s811_s0, %s509_s25  ;;  %s756_s8 = scalar_lea.vmem %s812_s1, %s511_s29 }
  0x12   : > { %vm258_vm0 = vcmask 125952   ;;  %v692_v0 = vmov 0.0  }
  0x13   : > { %259 = vst.msk [vmem:[#allocation2] sm:$0xf] %vm258_vm0, %v692_v0 }
  0x14 PF: > { %v594_v1 = vld [vmem:[%s756_s8 + $0x38] sm:$0xff]   ;;  %v693_v2 = vmov 0.0   ;;  %v595_v3 = vld [vmem:[%s756_s8 + $0x30] sm:$0xff]   ;;  %vm694_vm1 = vmmov 0   ;;  %v596_v4 = vld [vmem:[%s756_s8 + $0x28] sm:$0xff]   ;;  %vm367_vm2 = vcmask 125952  }
  0x15   : > { %540 = vmatprep.subr.bf16.mxu0 %v693_v2  ;;  %556 = vmatprep.mubr.msk.bf16.mxu0 %vm694_vm1, %v693_v2  ;;  %v597_v5 = vld [vmem:[%s756_s8 + $0x20] sm:$0xff]   ;;  %v598_v6 = vld [vmem:[%s756_s8 + $0x18] sm:$0xff]   ;;  %v599_v7 = vld [vmem:[%s756_s8 + $0x10] sm:$0xff]   ;;  %p521_p6 = scmp.ne.s32.totalorder %s741_s22, 1 }
  0x16   : > { %541 = vmatpush3.bf16.msra.mxu0 %v594_v1  ;;  %v600_v8 = vld [vmem:[%s756_s8 + $0x8] sm:$0xff]   ;;  %v601_v9 = vld [vmem:[%s756_s8] sm:$0xff]   ;;  %s695_s11 = smov (!%p521_p6), 8   ;;  %s696_s14 = smov (!%p521_p6), 120  }
  0x17   : > { %542 = vmatprep.subr.bf16.mxu0 %v693_v2  ;;  %v261_v10 = vld [vmem:[%s751_s28] sm:$0x3] }
  0x1a   : > { %543 = vmatpush3.bf16.msra.mxu0 %v595_v3  ;;  %v260_v11 = vld [vmem:[#allocation2] sm:$0xf] }
  0x1b   : > { %544 = vmatprep.subr.bf16.mxu0 %v693_v2 }
  0x1e   : > { %545 = vmatpush3.bf16.msra.mxu0 %v596_v4 }
  0x1f   : > { %546 = vmatprep.subr.bf16.mxu0 %v693_v2 }
  0x22   : > { %547 = vmatpush3.bf16.msra.mxu0 %v597_v5 }
  0x23   : > { %548 = vmatprep.subr.bf16.mxu0 %v693_v2 }
  0x26   : > { %549 = vmatpush3.bf16.msra.mxu0 %v598_v6 }
  0x27   : > { %550 = vmatprep.subr.bf16.mxu0 %v693_v2 }
  0x2a   : > { %551 = vmatpush3.bf16.msra.mxu0 %v599_v7 }
  0x2b   : > { %552 = vmatprep.subr.bf16.mxu0 %v693_v2 }
  0x2e   : > { %553 = vmatpush3.bf16.msra.mxu0 %v600_v8 }
  0x2f   : > { %554 = vmatprep.subr.bf16.mxu0 %v693_v2 }
  0x32   : > { %555 = vmatpush3.bf16.msra.mxu0 %v601_v9 }
  0x35   : > { %557 = vmatmul.mubr.bf16.vlgmr.msra.gmra.mxu0 %v261_v10 }
  0xf5   : > { %v360_v12 = vpop.f32.mrf.mxu0 }
  0xf6   : > { %v366_v13 = vadd.f32 %v360_v12, %v260_v11 }
  0xf7   : > { %v558_v14 = vpop.f32.mrf.mxu0  ;;  %372 = sbr.rel (%p521_p6) target bundleno = 488 (0x1e8), region = 44 }
  0xf8   : > { %368 = vst.msk [vmem:[#allocation2] sm:$0xf] %vm367_vm2, %v366_v13 }
  0xf9   : > { %v363_v15 = vpop.f32.mrf.mxu0 }
  0xfb   : > { %v559_v16 = vpop.f32.mrf.mxu0 }
  0xfc   : > { %v392_v17 = vld [vmem:[%s814_s3] sm:$0xf]  ;;  %vm382_vm3 = vcmask 60416  }
  0xfd   : > { %394 = vrot.lane.b32.xlu0 %v392_v17, %s695_s11  ;;  %v522_v19 = vld [vmem:[%s813_s2] ss:$0 sm:$0xff] }
  0xff   : > { %v373_v18 = vld [vmem:[#allocation2] sm:$0xf] }
 0x100   : > { %v381_v20 = vadd.f32 %v522_v19, %v373_v18 }
 0x102   : > { %385 = vrot.lane.b32.xlu1 %v381_v20, %s696_s14  ;;  %383 = vst.msk [vmem:[#allocation3] sm:$0xf] %vm382_vm3, %v381_v20  ;;  %v389_v21 = vmul.f32 0.5, %v381_v20 }
 0x104   : > { %v390_v22 = vmul.f32 1.442695, %v389_v21 }
 0x106   : > { %602 = vpow2.f32 %v390_v22 }
 0x113   : > { %v603_v23 = vpop.eup %602 }
 0x16f   : > { %v395_v24 = vpop.permute.xlu0 %394 }
 0x170   : > { %v397_v25 = vmul.f32 %v603_v23, %v395_v24 }
 0x172   : > { %399 = vrot.lane.b32.xlu0 %v397_v25, %s696_s14 }
 0x174   : > { %v386_v26 = vpop.permute.xlu1 %385 }
 0x175   : > { %388 = vst.msk [vmem:[#allocation5] sm:$0xf] %vm382_vm3, %v386_v26 }
 0x1e4   : > { %v400_v27 = vpop.permute.xlu0 %399 }
 0x1e5   : > { %v402_v28 = vadd.f32 %v400_v27, %v381_v20 }
 0x1e7   : > { %403 = vst.msk [vmem:[#allocation7] sm:$0xf] %vm382_vm3, %v402_v28 }
 0x1e8 PF: > { %p572_p7 = scmp.eq.s32.totalorder %s741_s22, 1  ;;  %s697_s15 = smov [#allocation5]  }
 0x1e9   : > { %s422_s16 = sshll.u32 %s697_s15, 4  ;;  %s698_s17 = smov [#allocation3]   ;;  %s423_s16 = int_to_ptr.vmem [resolvable:$true] %s422_s16 }
 0x1ea   : > { %s411_s18 = sshll.u32 %s698_s17, 4  ;;  %s604_s19 = scalar_lea.vmem %s423_s16, 64  ;;  %s412_s18 = int_to_ptr.vmem [resolvable:$true] %s411_s18 }
 0x1eb   : > { %p605_p8 = scmp.ne.s32.totalorder %s423_s16, %s604_s19  ;;  %p611_p11 = scmp.lt.s32.totalorder %s423_s16, %s423_s16 }
 0x1ec   : > { %p612_p12 = scmp.lt.s32.totalorder %s604_s19, %s604_s19 }
 0x1ed   : > { %p606_p9 = pnand %p605_p8, %p572_p7 }
 0x1ee   : > { %p613_p13 = por %p612_p12, %p611_p11 }
 0x1ef   : > { %p607_p10 = pneg %p606_p9 }
 0x1f1   : > { %p614_p0 = pnand %p613_p13, %p607_p10 }
 0x1f3   : > { %617 = shalt.err (!%p614_p0)
}
 0x1f4   : > { %563 = dma.vmem_to_hbm [thread:$0]  (%p572_p7), %s423_s16, 64, %s816_s5, [#allocation6]  }
 0x1f5   : > { %s628_s24 = scalar_lea.vmem %s412_s18, 64  ;;  %p635_p4 = scmp.lt.s32.totalorder %s412_s18, %s412_s18 }
 0x1f6   : > { %p629_p1 = scmp.ne.s32.totalorder %s412_s18, %s628_s24  ;;  %p636_p5 = scmp.lt.s32.totalorder %s628_s24, %s628_s24 }
 0x1f8   : > { %p630_p2 = pnand %p629_p1, %p572_p7  ;;  %p637_p6 = por %p636_p5, %p635_p4 }
 0x1fa   : > { %p631_p3 = pneg %p630_p2 }
 0x1fc   : > { %p638_p8 = pnand %p637_p6, %p631_p3 }
 0x1fe   : > { %641 = shalt.err (!%p638_p8)
}
 0x1ff   : > { %561 = dma.vmem_to_hbm [thread:$0]  (%p572_p7), %s412_s18, 64, %s815_s4, [#allocation4]  }
 0x200   : > { %s699_s27 = smov [#allocation7]  }
 0x201   : > { %s433_s28 = sshll.u32 %s699_s27, 4  ;;  %s434_s28 = int_to_ptr.vmem [resolvable:$true] %s433_s28 }
 0x202   : > { %s652_s29 = scalar_lea.vmem %s434_s28, 64  ;;  %p659_p12 = scmp.lt.s32.totalorder %s434_s28, %s434_s28 }
 0x203   : > { %p653_p9 = scmp.ne.s32.totalorder %s434_s28, %s652_s29  ;;  %p660_p13 = scmp.lt.s32.totalorder %s652_s29, %s652_s29 }
 0x205   : > { %p654_p10 = pnand %p653_p9, %p572_p7  ;;  %p661_p0 = por %p660_p13, %p659_p12 }
 0x207   : > { %p655_p11 = pneg %p654_p10 }
 0x209   : > { %p662_p1 = pnand %p661_p0, %p655_p11 }
 0x20b   : > { %665 = shalt.err (!%p662_p1)
}
 0x20c   : > { %565 = dma.vmem_to_hbm [thread:$0]  (%p572_p7), %s434_s28, 64, %s817_s6, [#allocation6]  }
 0x20d   : > { %681 = dma.done.wait (%p572_p7), [#allocation4], 64  }
 0x20e   : > { %683 = vsyncadd (%p572_p7), [#allocation4], 4294967232 }
 0x20f   : > { %685 = dma.done.wait (%p572_p7), [#allocation6], 128  }
 0x210   : > { %687 = vsyncadd (%p572_p7), [#allocation6], 4294967168 }
 0x211 PF: > { %s19_s21 = sadd.s32 1, %s690_s21  }
 0x212   : > { %p16_p2 = scmp.ge.s32.totalorder %s19_s21, 4  }
 0x214   :  { %18 = sbr.rel (!%p16_p2) target bundleno = 2 (0x2), region = 90 }
 0x219   :  { %454 = vsyncpa [#allocation4], 1 }
 0x21a   :  { %456 = vsyncpa [#allocation4 + $0x1], 1 }
 0x21b   :  { %457 = vsyncpa [#allocation6], 1 }

</bundles_post_ra>
